<compile_context>
chip_gen: v6e
topology: v6e:2x2x1
jax: 0.10.0
libtpu: 0.0.40
codegen_flags: <defaults>
</compile_context>

<pallas_src>
import functools

import jax
import jax.numpy as jnp
from jax.experimental import pallas as pl
from jax.experimental.pallas import tpu as pltpu

C_HIDDEN = 1280  # c_ in the PyTorch module


def _pooled_silu_kernel(x_ref, wc_ref, scale_ref, shift_ref, o_ref, acc_ref):
    hw = pl.program_id(1)

    @pl.when(hw == 0)
    def _():
        acc_ref[...] = jnp.zeros_like(acc_ref)

    x = x_ref[0]                                                      # [THW, C1] bf16
    # 1x1 conv == per-pixel matmul; bf16 operands, f32 MXU accumulation
    y = jnp.dot(x, wc_ref[...], preferred_element_type=jnp.float32)   # [THW, C_] f32
    # BatchNorm (eval) folded into per-channel scale/shift, computed in f32
    y = y * scale_ref[...] + shift_ref[...]
    # SiLU in f32 (EUP sigmoid, VPU multiply)
    y = y * jax.nn.sigmoid(y)
    # pooled *sum*; the 1/HW factor is folded into the wrapper-side linear
    acc_ref[...] += jnp.sum(y, axis=0, keepdims=True)

    @pl.when(hw == pl.num_programs(1) - 1)
    def _():
        o_ref[0] = acc_ref[...]


def _pick_thw(hw):
    for cand in (512, 256, 128, 64, 32, 16, 8):
        if hw % cand == 0:
            return cand
    return hw  # odd/small HW: single full-extent tile (legal: equals full dim)


@functools.partial(jax.jit, static_argnames=("thw",))
def reflect_classify_head(x_nchw, conv_w, bn_scale, bn_shift, lin_w, lin_b, *, thw=None):
    N, C1, H, W = x_nchw.shape
    HW = H * W
    C_ = conv_w.shape[1]
    C2 = lin_w.shape[1]
    if thw is None:
        thw = _pick_thw(HW)
    assert HW % thw == 0, (HW, thw)

    # channels-last pixel matrix; bf16 inputs / weights (f32 accumulation in-kernel)
    x = jnp.transpose(x_nchw, (0, 2, 3, 1)).reshape(N, HW, C1).astype(jnp.bfloat16)
    wc = conv_w.astype(jnp.bfloat16)
    scale = bn_scale.reshape(1, C_).astype(jnp.float32)
    shift = bn_shift.reshape(1, C_).astype(jnp.float32)

    # VMEM budget estimate (keeps the same tiles legal on v7x's 64 MiB VMEM)
    est = (2 * thw * C1 * 2        # double-buffered bf16 x tile
           + 2 * C1 * C_ * 2       # double-buffered bf16 conv weight
           + 2 * 2 * C_ * 4        # bn scale + shift (f32, double-buffered)
           + 2 * C_ * 4            # pooled output block
           + C_ * 4                # f32 accumulator scratch
           + thw * C_ * 4)         # [THW, C_] f32 SiLU intermediate
    vmem_limit = int(min(48 * 2**20, max(8 * 2**20, 2 * est)))

    cost = pl.CostEstimate(
        flops=2 * N * HW * C1 * C_ + 4 * N * HW * C_,
        transcendentals=N * HW * C_,
        bytes_accessed=x.size * 2 + wc.size * 2
        + (scale.size + shift.size) * 4 + N * C_ * 4,
    )

    pooled_sum = pl.pallas_call(
        _pooled_silu_kernel,
        out_shape=jax.ShapeDtypeStruct((N, 1, C_), jnp.float32),
        grid_spec=pltpu.PrefetchScalarGridSpec(
            num_scalar_prefetch=0,
            grid=(N, HW // thw),
            in_specs=[
                pl.BlockSpec((1, thw, C1), lambda n, h: (n, h, 0)),   # x tile
                pl.BlockSpec((C1, C_), lambda n, h: (0, 0)),          # conv weight
                pl.BlockSpec((1, C_), lambda n, h: (0, 0)),           # bn scale
                pl.BlockSpec((1, C_), lambda n, h: (0, 0)),           # bn shift
            ],
            out_specs=pl.BlockSpec((1, 1, C_), lambda n, h: (n, 0, 0)),
            scratch_shapes=[pltpu.VMEM((1, C_), jnp.float32)],
        ),
        compiler_params=pltpu.CompilerParams(
            dimension_semantics=("parallel", "arbitrary"),
            vmem_limit_bytes=vmem_limit,
        ),
        cost_estimate=cost,
    )(x, wc, scale, shift)

    pooled_sum = pooled_sum.reshape(N, C_)
    # Final Linear in XLA on the lane-dense pooled output; 1/HW folded into weight.
    # TODO(synk): nn.Dropout(inplace=True) is identity in eval mode; no op emitted.
    wl = lin_w.astype(jnp.float32) * (1.0 / HW)
    return pooled_sum @ wl + lin_b.reshape(1, C2)


def make_params(key, c1, c2, c_=C_HIDDEN, eps=1e-3):
    """Deterministic synthetic parameters matching the module's shapes."""
    k_conv, k_mean, k_var, k_lin, k_bias, k_gamma, k_beta = jax.random.split(key, 7)
    # Conv2d(c1, c_, 1, bias=False): weight [c_, c1, 1, 1] -> [c1, c_]
    conv_w = (jax.random.normal(k_conv, (c_, c1), jnp.float32) * 0.1).T
    # BatchNorm2d(c_) eval-mode stats / affine params
    gamma = 1.0 + 0.05 * jax.random.normal(k_gamma, (c_,), jnp.float32)
    beta = 0.05 * jax.random.normal(k_beta, (c_,), jnp.float32)
    running_mean = 0.05 * jax.random.normal(k_mean, (c_,), jnp.float32)
    running_var = 1.0 + 0.1 * jnp.abs(jax.random.normal(k_var, (c_,), jnp.float32))
    scale = gamma * jax.lax.rsqrt(running_var + eps)
    shift = beta - running_mean * scale
    # Linear(c_, c2): weight [c2, c_] -> [c_, c2], bias [c2]
    lin_w = (jax.random.normal(k_lin, (c2, c_), jnp.float32) * 0.02).T
    lin_b = 0.01 * jax.random.normal(k_bias, (c2,), jnp.float32)
    return dict(
        conv_w=conv_w,
        bn_scale=scale.reshape(1, c_),
        bn_shift=shift.reshape(1, c_),
        lin_w=lin_w,
        lin_b=lin_b.reshape(1, c2),
    )


def reference_forward(x_nchw, p):
    """Plain-JAX reference (bf16 conv operands, f32 accumulation, like the kernel)."""
    N, C1, H, W = x_nchw.shape
    x = jnp.transpose(x_nchw, (0, 2, 3, 1)).reshape(N, H * W, C1).astype(jnp.bfloat16)
    w = p["conv_w"].astype(jnp.bfloat16)
    y = jnp.einsum("npc,ch->nph", x, w, preferred_element_type=jnp.float32)
    y = y * p["bn_scale"][None] + p["bn_shift"][None]
    y = y * jax.nn.sigmoid(y)
    pooled = jnp.mean(y, axis=1)                 # [N, C_]
    return pooled @ p["lin_w"] + p["lin_b"]      # [N, C2]


if __name__ == "__main__":
    key = jax.random.PRNGKey(0)
    k_x, k_p = jax.random.split(key)

    N, C1, H, W = 2, 4, 16, 16
    C2 = 8

    x = jax.random.normal(k_x, (N, C1, H, W), jnp.float32)
    params = make_params(k_p, C1, C2)

    out = reflect_classify_head(
        x,
        params["conv_w"],
        params["bn_scale"],
        params["bn_shift"],
        params["lin_w"],
        params["lin_b"],
        thw=64,  # HW=256 -> 4 spatial tiles, exercises the pooled-sum accumulator
    )
    out = jax.block_until_ready(out)

    ref = reference_forward(x, params)
    assert out.shape == (N, C2), out.shape
    assert jnp.allclose(out, ref, rtol=2e-3, atol=2e-3), (out, ref)

    print("KERNEL_OK")
</pallas_src>

<mosaic_0001>
module attributes {stable_mosaic.version = 11 : i64} {
  func.func @_pooled_silu_kernel(%arg0: i32, %arg1: i32, %arg2: memref<1x64x4xbf16, #tpu.memory_space<vmem>>, %arg3: memref<4x1280xbf16, #tpu.memory_space<vmem>>, %arg4: memref<1x1280xf32, #tpu.memory_space<vmem>>, %arg5: memref<1x1280xf32, #tpu.memory_space<vmem>>, %arg6: memref<1x1x1280xf32, #tpu.memory_space<vmem>>, %arg7: memref<1x1280xf32, #tpu.memory_space<vmem>>) attributes {dimension_semantics = [#tpu.dimension_semantics<parallel>, #tpu.dimension_semantics<arbitrary>], iteration_bounds = array<i64: 2, 4>, scalar_prefetch = 0 : i64, scratch_operands = 1 : i64, tpu.core_type = #tpu.core_type<tc>, window_params = [{transform_indices = @transform_0, window_bounds = array<i64: 1, 64, 4>}, {pipeline_mode = #tpu.pipeline_mode<synchronous>, transform_indices = @transform_1, window_bounds = array<i64: 4, 1280>}, {pipeline_mode = #tpu.pipeline_mode<synchronous>, transform_indices = @transform_2, window_bounds = array<i64: 1, 1280>}, {pipeline_mode = #tpu.pipeline_mode<synchronous>, transform_indices = @transform_3, window_bounds = array<i64: 1, 1280>}, {transform_indices = @transform_4, window_bounds = array<i64: 1, 1, 1280>}]} {
    %c0_i32 = arith.constant 0 : i32
    %0 = arith.cmpi eq, %arg1, %c0_i32 : i32
    %1 = arith.extui %0 : i1 to i32
    %c0_i32_0 = arith.constant 0 : i32
    %2 = arith.cmpi ne, %1, %c0_i32_0 : i32
    scf.if %2 {
      %cst_16 = arith.constant 0.000000e+00 : f32
      %27 = vector.broadcast %cst_16 : f32 to vector<1x1280xf32>
      %c0_17 = arith.constant 0 : index
      %c0_18 = arith.constant 0 : index
      %28 = vector.load %arg7[%c0_17, %c0_18] : memref<1x1280xf32, #tpu.memory_space<vmem>>, vector<1x1280xf32>
      tpu.vector_store %arg7[%c0_17, %c0_18], %27 {strides = array<i32>} : memref<1x1280xf32, #tpu.memory_space<vmem>>, vector<1x1280xf32>,
    } else {
    }
    %c0 = arith.constant 0 : index
    %c0_1 = arith.constant 0 : index
    %c0_2 = arith.constant 0 : index
    %3 = vector.load %arg2[%c0, %c0_1, %c0_2] : memref<1x64x4xbf16, #tpu.memory_space<vmem>>, vector<1x64x4xbf16>
    %4 = vector.shape_cast %3 : vector<1x64x4xbf16> to vector<64x4xbf16>
    %c0_3 = arith.constant 0 : index
    %c0_4 = arith.constant 0 : index
    %5 = vector.load %arg3[%c0_3, %c0_4] : memref<4x1280xbf16, #tpu.memory_space<vmem>>, vector<4x1280xbf16>
    %cst = arith.constant dense<0.000000e+00> : vector<64x1280xf32>
    %6 = tpu.matmul %4, %5, %cst {dimension_numbers = #tpu.dot_dimension_numbers<[1], [0], [0], [1], [0, 0, 1, 1], [], []>} : vector<64x4xbf16>, vector<4x1280xbf16>, vector<64x1280xf32> -> vector<64x1280xf32>
    %c0_5 = arith.constant 0 : index
    %c0_6 = arith.constant 0 : index
    %7 = vector.load %arg4[%c0_5, %c0_6] : memref<1x1280xf32, #tpu.memory_space<vmem>>, vector<1x1280xf32>
    %8 = vector.broadcast %7 : vector<1x1280xf32> to vector<64x1280xf32>
    %9 = arith.mulf %6, %8 : vector<64x1280xf32>
    %c0_7 = arith.constant 0 : index
    %c0_8 = arith.constant 0 : index
    %10 = vector.load %arg5[%c0_7, %c0_8] : memref<1x1280xf32, #tpu.memory_space<vmem>>, vector<1x1280xf32>
    %11 = vector.broadcast %10 : vector<1x1280xf32> to vector<64x1280xf32>
    %12 = arith.addf %9, %11 : vector<64x1280xf32>
    %13 = arith.negf %12 : vector<64x1280xf32>
    %14 = math.exp %13 : vector<64x1280xf32>
    %cst_9 = arith.constant 1.000000e+00 : f32
    %15 = vector.broadcast %cst_9 : f32 to vector<64x1280xf32>
    %16 = arith.addf %15, %14 : vector<64x1280xf32>
    %17 = arith.divf %15, %16 : vector<64x1280xf32>
    %18 = arith.mulf %12, %17 : vector<64x1280xf32>
    %c0_10 = arith.constant 0 : index
    %c0_11 = arith.constant 0 : index
    %19 = vector.load %arg7[%c0_10, %c0_11] : memref<1x1280xf32, #tpu.memory_space<vmem>>, vector<1x1280xf32>
    %cst_12 = arith.constant dense<0.000000e+00> : vector<1280xf32>
    %20 = vector.multi_reduction <add>, %18, %cst_12 [0] : vector<64x1280xf32> to vector<1280xf32>
    %21 = vector.shape_cast %20 : vector<1280xf32> to vector<1x1280xf32>
    %22 = arith.addf %19, %21 : vector<1x1280xf32>
    %c0_13 = arith.constant 0 : index
    %c0_14 = arith.constant 0 : index
    %23 = vector.load %arg7[%c0_13, %c0_14] : memref<1x1280xf32, #tpu.memory_space<vmem>>, vector<1x1280xf32>
    tpu.vector_store %arg7[%c0_13, %c0_14], %22 {strides = array<i32>} : memref<1x1280xf32, #tpu.memory_space<vmem>>, vector<1x1280xf32>,
    %c3_i32 = arith.constant 3 : i32
    %24 = arith.cmpi eq, %arg1, %c3_i32 : i32
    %25 = arith.extui %24 : i1 to i32
    %c0_i32_15 = arith.constant 0 : i32
    %26 = arith.cmpi ne, %25, %c0_i32_15 : i32
    scf.if %26 {
      %c0_16 = arith.constant 0 : index
      %c0_17 = arith.constant 0 : index
      %27 = vector.load %arg7[%c0_16, %c0_17] : memref<1x1280xf32, #tpu.memory_space<vmem>>, vector<1x1280xf32>
      %c0_18 = arith.constant 0 : index
      %c0_19 = arith.constant 0 : index
      %c0_20 = arith.constant 0 : index
      %28 = vector.load %arg6[%c0_18, %c0_19, %c0_20] : memref<1x1x1280xf32, #tpu.memory_space<vmem>>, vector<1x1x1280xf32>
      %29 = vector.shape_cast %28 : vector<1x1x1280xf32> to vector<1x1280xf32>
      %30 = vector.shape_cast %27 : vector<1x1280xf32> to vector<1x1x1280xf32>
      tpu.vector_store %arg6[%c0_18, %c0_19, %c0_20], %30 {strides = array<i32>} : memref<1x1x1280xf32, #tpu.memory_space<vmem>>, vector<1x1x1280xf32>,
    } else {
    }
    return
  }
  func.func @transform_0(%arg0: i32, %arg1: i32) -> (i32, i32, i32) {
    %c0_i32 = arith.constant 0 : i32
    %c0_i32_0 = arith.constant 0 : i32
    return %arg0, %arg1, %c0_i32 : i32, i32, i32
  }
  func.func @transform_1(%arg0: i32, %arg1: i32) -> (i32, i32) {
    %c0_i32 = arith.constant 0 : i32
    %c0_i32_0 = arith.constant 0 : i32
    %c0_i32_1 = arith.constant 0 : i32
    return %c0_i32, %c0_i32_0 : i32, i32
  }
  func.func @transform_2(%arg0: i32, %arg1: i32) -> (i32, i32) {
    %c0_i32 = arith.constant 0 : i32
    %c0_i32_0 = arith.constant 0 : i32
    %c0_i32_1 = arith.constant 0 : i32
    return %c0_i32, %c0_i32_0 : i32, i32
  }
  func.func @transform_3(%arg0: i32, %arg1: i32) -> (i32, i32) {
    %c0_i32 = arith.constant 0 : i32
    %c0_i32_0 = arith.constant 0 : i32
    %c0_i32_1 = arith.constant 0 : i32
    return %c0_i32, %c0_i32_0 : i32, i32
  }
  func.func @transform_4(%arg0: i32, %arg1: i32) -> (i32, i32, i32) {
    %c0_i32 = arith.constant 0 : i32
    %c0_i32_0 = arith.constant 0 : i32
    %c0_i32_1 = arith.constant 0 : i32
    return %arg0, %c0_i32, %c0_i32_0 : i32, i32, i32
  }
}

</mosaic_0001>

<bundles_post_ra>
// kernel: reflect_classify_head.1
= control target key start
LH: loop header
LB: loop body
LE: loop exit
PB: predicated region body
PF: predicated region fallthrough
CT: control target
= control target key end

     0   :  { %s2406_s15 = smov 0   ;;  %s2408_s16 = smov 0   ;;  %s3266_s0 = inlined_call_operand.vmem [shape: bf16[2,256,4], index: 0, kind: input, shape index: {}]   ;;  %s3267_s1 = inlined_call_operand.vmem [shape: bf16[4,1280], index: 1, kind: input, shape index: {}]   ;;  %s3268_s2 = inlined_call_operand.vmem [shape: f32[1,1280], index: 2, kind: input, shape index: {}]   ;;  %s3269_s3 = inlined_call_operand.vmem [shape: f32[1,1280], index: 3, kind: input, shape index: {}]   ;;  %s3270_s4 = inlined_call_operand.vmem [shape: f32[2,1,1280], index: 4, kind: output, shape index: {}]  }
   0x1   :  { %s2410_s17 = smov 0   ;;  %s2412_s18 = smov 0  }
   0x2   :  { %s2414_s19 = smov 0  }
   0x3 LB: > { %s23_s20 = sadd.s32 1, %s2367_s17  ;;  %s26_s21 = sadd.s32 1, %s2371_s18  ;;  %s2375_s19 = sphi %s2414_s19, %s14_s19   ;;  %s2371_s18 = sphi %s2412_s18, %s3399_s18   ;;  %s2367_s17 = sphi %s2410_s17, %s3398_s17   ;;  %s2363_s16 = sphi %s2408_s16, %s3397_s16   ;;  %s2359_s15 = sphi %s2406_s15, %s3396_s15  }
   0x4   : > { %p24_p0 = scmp.ge.s32.totalorder %s23_s20, 4  ;;  %p1846_p1 = scmp.ge.s32.totalorder %s2375_s19, 1 }
   0x5   : > { %p181_p2 = scmp.lt.s32.totalorder %s2375_s19, 9 }
   0x6   : > { %s3401_s20 = smov (%p24_p0, %s23_s20), 0  ;;  %s3403_s21 = smov (!%p24_p0, %s26_s21), %s2371_s18 }
   0x7   : > { %p182_p3 = pnand %p1846_p1, %p181_p2  ;;  %p28_p4 = scmp.ge.s32.totalorder %s3403_s21, 2 }
   0x9   : > { %s3405_s21 = smov (%p28_p4, %s3403_s21), 0  ;;  %185 = sbr.rel (%p182_p3) target bundleno = 462 (0x1ce), region = 36 }
   0xe   : > { %s1847_s22 = sshll.u32 %s2359_s15, 3  ;;  %p211_p5 = scmp.lt.s32.totalorder %s2363_s16, 1 }
   0xf   : > { %p213_p6 = scmp.lt.s32.totalorder %s1847_s22, 31  ;;  %p1850_p7 = scmp.ne.s32.totalorder %s2359_s15, 0 }
  0x10   : > { %s3407_s16 = smov (!%p211_p5, %s2363_s16), 1 }
  0x11   : > { %s3409_s22 = smov (!%p213_p6, %s1847_s22), 31  ;;  %s1848_s23 = sshll.u32 %s3407_s16, 5 }
  0x12   : > { %s1966_s24 = smul.u32 10, %s3407_s16  ;;  %s216_s25 = sadd.s32 %s1848_s23, %s3409_s22 }
  0x13   : > { %s1849_s26 = sshll.u32 %s216_s25, 2  ;;  %228 = sbr.rel (%p1850_p7) target bundleno = 28 (0x1c), region = 40 }
  0x14   : > { %s2442_s29 = scalar_lea.vmem %s3270_s4, %s1966_s24  ;;  %s2447_s6 = scalar_lea.vmem %s3266_s0, %s1849_s26 }
  0x18   : > { %v230_v0 = vlaneseq  ;;  %v2377_v1 = vmov 0.0  }
  0x19   : > { %229 = vst [vmem:[#allocation2] sm:$0xff] %v2377_v1 }
  0x1a   : > { %vm232_vm0 = vcmp.lt.s32.totalorder %v230_v0, 256 }
  0x1b   : > { %234 = vst.msk [vmem:[#allocation2 + $0x8] sm:$0x3] %vm232_vm0, %v2377_v1 }
  0x1c PF: > { %v3271_v2 = vlaneseq  ;;  %v2378_v3 = vmov 1983009808   ;;  %v2379_v5 = vmov 0   ;;  %v243_v6 = vld [vmem:[%s3267_s1] sm:$0xff]  ;;  %v244_v10 = vld [vmem:[%s3267_s1 + $0x8] sm:$0xff]  ;;  %vm324_vm1 = vcmask 1041408  }
  0x1d   : > { %v271_v4 = vunpack.c.l.s4 %v2378_v3  ;;  %387 = vmatprep.mubr.bf16.mxu0 %v2379_v5  ;;  %407 = vmatprep.mubr.bf16.mxu1 %v2379_v5  ;;  %v269_v8 = vcombine.high %v243_v6, %v243_v6  ;;  %v286_v12 = vcombine.high %v244_v10, %v244_v10  ;;  %v2012_v21 = vld [vmem:[%s2447_s6] sm:$0xff]   ;;  %v2013_v22 = vld [vmem:[%s2447_s6 + $0x10] sm:$0xff]   ;;  %vm311_vm2 = vcmask 31744   ;;  %v2014_v28 = vld [vmem:[%s2447_s6 + $0x8] sm:$0xff]   ;;  %p1961_p8 = scmp.ne.s32.totalorder %s2359_s15, 3 }
  0x1e   : > { %v2456_v7 = vshrl.u32 %v3271_v2, 7  ;;  %v1855_v23 = vld.sshfl [vmem:[%s3267_s1 + $0x10] sm:$0x33 pattern:$0x76325410]  ;;  %v2015_v29 = vld [vmem:[%s2447_s6 + $0x18] sm:$0xff]  }
  0x1f   : > { %v272_v9 = vunpack.c.0.s8 %v271_v4  ;;  %v310_v27 = vcombine.high %v1855_v23, %v1855_v23  ;;  %v350_v31 = vsel %vm324_vm1, %v1855_v23, 0  ;;  %v2524_v33 = vld [vmem:[%s3268_s2] sm:$0xff] }
  0x20   : > { %3308 = vst [vmem:[#allocation3_spill] sm:$0xff] %v2456_v7  ;;  %v2519_v32 = vsub.s32 0, %v2456_v7  ;;  %v2527_v34 = vsub.s32 1, %v2456_v7  ;;  %v2532_v35 = vld [vmem:[%s3269_s3] sm:$0xff] }
  0x21   : > { %v275_v11 = vsub.s32 %v272_v9, %v2456_v7 }
  0x22   : > { %v727_v36 = vrot.slane %v2524_v33, %v2519_v32  ;;  %v2538_v37 = vrot.slane %v2532_v35, %v2519_v32  ;;  %v2542_v38 = vrot.slane %v2524_v33, %v2527_v34  ;;  %v2546_v43 = vrot.slane %v2532_v35, %v2527_v34 }
  0x23   : > { %v276_v13 = vrot.slane %v243_v6, %v275_v11  ;;  %v283_v14 = vrot.slane %v269_v8, %v275_v11  ;;  %v293_v15 = vrot.slane %v244_v10, %v275_v11  ;;  %v300_v20 = vrot.slane %v286_v12, %v275_v11 }
  0x25   : > { %v284_v16 = vcombine.high %v276_v13, %v276_v13  ;;  %v326_v17 = vsel %vm324_vm1, %v276_v13, 0  ;;  %v285_v18 = vcombine.high %v283_v14, %v283_v14  ;;  %v301_v19 = vcombine.high %v293_v15, %v293_v15 }
  0x26   : > { %v332_v24 = vsel %vm324_vm1, %v283_v14, 0  ;;  %v338_v25 = vsel %vm324_vm1, %v293_v15, 0  ;;  %v302_v26 = vcombine.high %v300_v20, %v300_v20  ;;  %v344_v30 = vsel %vm324_vm1, %v300_v20, 0 }
  0x27   : > { %1856 = vmatprep.subr.msk.bf16.mxu0 %vm324_vm1, %v284_v16  ;;  %1964 = vmatprep.subr.msk.bf16.mxu1 %vm324_vm1, %v284_v16 }
  0x28   : > { %370 = vmatpush1.bf16.msra.mxu0 %v326_v17  ;;  %1965 = vmatpush1.bf16.msra.mxu1 %v326_v17 }
  0x29   : > { %1861 = vmatprep.subr.msk.bf16.mxu1 %vm324_vm1, %v285_v18  ;;  %1866 = vmatprep.subr.msk.bf16.mxu0 %vm324_vm1, %v301_v19 }
  0x2b   : > { %1857 = vmatmul.mubr.msk.bf16.vlgmr.msra.gmra.mxu0 %vm311_vm2, %v2012_v21  ;;  %1859 = vmatmul.mubr.msk.bf16.vlgmr.msra.gmra.mxu1 %vm311_vm2, %v2013_v22 }
  0x2c   : > { %443 = vmatpush1.bf16.msra.mxu1 %v332_v24  ;;  %516 = vmatpush1.bf16.msra.mxu0 %v338_v25 }
  0x2d   : > { %397 = vmatprep.mubr.bf16.mxu0 %v2379_v5  ;;  %417 = vmatprep.mubr.bf16.mxu1 %v2379_v5 }
  0x2e   : > { %1871 = vmatprep.subr.msk.bf16.mxu1 %vm324_vm1, %v302_v26  ;;  %1876 = vmatprep.subr.msk.bf16.mxu0 %vm324_vm1, %v310_v27 }
  0x33   : > { %1858 = vmatmul.mubr.msk.bf16.gmra.mxu0 %vm311_vm2, %v2014_v28  ;;  %1860 = vmatmul.mubr.msk.bf16.gmra.mxu1 %vm311_vm2, %v2015_v29 }
  0x34   : > { %460 = vmatprep.mubr.bf16.mxu1 %v2379_v5  ;;  %533 = vmatprep.mubr.bf16.mxu0 %v2379_v5 }
  0x3b   : > { %1862 = vmatmul.mubr.msk.bf16.vlgmr.msra.gmra.mxu1 %vm311_vm2, %v2012_v21  ;;  %1867 = vmatmul.mubr.msk.bf16.vlgmr.msra.gmra.mxu0 %vm311_vm2, %v2012_v21 }
  0x3c   : > { %589 = vmatpush1.bf16.msra.mxu1 %v344_v30  ;;  %662 = vmatpush1.bf16.msra.mxu0 %v350_v31 }
  0x3d   : > { %470 = vmatprep.mubr.bf16.mxu1 %v2379_v5  ;;  %543 = vmatprep.mubr.bf16.mxu0 %v2379_v5 }
  0x43   : > { %1863 = vmatmul.mubr.msk.bf16.gmra.mxu1 %vm311_vm2, %v2014_v28  ;;  %1868 = vmatmul.mubr.msk.bf16.gmra.mxu0 %vm311_vm2, %v2014_v28 }
  0x44   : > { %480 = vmatprep.mubr.bf16.mxu1 %v2379_v5  ;;  %553 = vmatprep.mubr.bf16.mxu0 %v2379_v5 }
  0x4b   : > { %1864 = vmatmul.mubr.msk.bf16.gmra.mxu1 %vm311_vm2, %v2013_v22  ;;  %1869 = vmatmul.mubr.msk.bf16.gmra.mxu0 %vm311_vm2, %v2013_v22 }
  0x4c   : > { %490 = vmatprep.mubr.bf16.mxu1 %v2379_v5  ;;  %563 = vmatprep.mubr.bf16.mxu0 %v2379_v5 }
  0x53   : > { %1865 = vmatmul.mubr.msk.bf16.gmra.mxu1 %vm311_vm2, %v2015_v29  ;;  %1870 = vmatmul.mubr.msk.bf16.gmra.mxu0 %vm311_vm2, %v2015_v29 }
  0x54   : > { %606 = vmatprep.mubr.bf16.mxu1 %v2379_v5  ;;  %679 = vmatprep.mubr.bf16.mxu0 %v2379_v5 }
  0x5b   : > { %1872 = vmatmul.mubr.msk.bf16.vlgmr.msra.gmra.mxu1 %vm311_vm2, %v2012_v21  ;;  %1877 = vmatmul.mubr.msk.bf16.vlgmr.msra.gmra.mxu0 %vm311_vm2, %v2012_v21 }
  0x5c   : > { %616 = vmatprep.mubr.bf16.mxu1 %v2379_v5  ;;  %689 = vmatprep.mubr.bf16.mxu0 %v2379_v5 }
  0x63   : > { %1873 = vmatmul.mubr.msk.bf16.gmra.mxu1 %vm311_vm2, %v2014_v28  ;;  %1878 = vmatmul.mubr.msk.bf16.gmra.mxu0 %vm311_vm2, %v2014_v28 }
  0x64   : > { %626 = vmatprep.mubr.bf16.mxu1 %v2379_v5  ;;  %699 = vmatprep.mubr.bf16.mxu0 %v2379_v5 }
  0x6b   : > { %1874 = vmatmul.mubr.msk.bf16.gmra.mxu1 %vm311_vm2, %v2013_v22  ;;  %1879 = vmatmul.mubr.msk.bf16.gmra.mxu0 %vm311_vm2, %v2013_v22 }
  0x6c   : > { %636 = vmatprep.mubr.bf16.mxu1 %v2379_v5  ;;  %709 = vmatprep.mubr.bf16.mxu0 %v2379_v5 }
  0x73   : > { %1875 = vmatmul.mubr.msk.bf16.gmra.mxu1 %vm311_vm2, %v2015_v29  ;;  %1880 = vmatmul.mubr.msk.bf16.gmra.mxu0 %vm311_vm2, %v2015_v29 }
  0xeb   : > { %v389_v39 = vpop.f32.mrf.mxu0  ;;  %v409_v40 = vpop.f32.mrf.mxu1 }
  0xec   : > { %v774_v41 = vmul.f32 %v727_v36, %v389_v39  ;;  %v814_v42 = vmul.f32 %v727_v36, %v409_v40 }
  0xed   : > { %v391_v44 = vpop.f32.mrf.mxu0  ;;  %v411_v45 = vpop.f32.mrf.mxu1 }
  0xee   : > { %v2549_v46 = vadd.f32 %v2538_v37, %v774_v41  ;;  %v2552_v47 = vadd.f32 %v2538_v37, %v814_v42  ;;  %v775_v48 = vmul.f32 %v2542_v38, %v391_v44  ;;  %v815_v49 = vmul.f32 %v2542_v38, %v411_v45 }
  0xef   : > { %v393_v50 = vpop.f32.mrf.mxu0  ;;  %v413_v51 = vpop.f32.mrf.mxu1 }
  0xf0   : > { %v1881_v52 = vmul.f32 -1.442695, %v2549_v46  ;;  %v1921_v53 = vmul.f32 -1.442695, %v2552_v47  ;;  %v2559_v54 = vadd.f32 %v2546_v43, %v775_v48  ;;  %v2562_v55 = vadd.f32 %v2546_v43, %v815_v49 }
  0xf1   : > { %v784_v56 = vmul.f32 %v727_v36, %v393_v50  ;;  %v824_v57 = vmul.f32 %v727_v36, %v413_v51  ;;  %v395_v58 = vpop.f32.mrf.mxu0  ;;  %v415_v59 = vpop.f32.mrf.mxu1 }
  0xf2   : > { %2017 = vpow2.f32 %v1881_v52  ;;  %v1882_v60 = vmul.f32 -1.442695, %v2559_v54  ;;  %v1922_v61 = vmul.f32 -1.442695, %v2562_v55  ;;  %v785_v62 = vmul.f32 %v2542_v38, %v395_v58 }
  0xf3   : > { %2019 = vpow2.f32 %v1921_v53  ;;  %v2568_v63 = vadd.f32 %v2538_v37, %v784_v56  ;;  %v2571_v0 = vadd.f32 %v2538_v37, %v824_v57  ;;  %v825_v1 = vmul.f32 %v2542_v38, %v415_v59  ;;  %v399_v3 = vpop.f32.mrf.mxu0  ;;  %v419_v4 = vpop.f32.mrf.mxu1 }
  0xf4   : > { %2021 = vpow2.f32 %v1882_v60  ;;  %v2575_v5 = vadd.f32 %v2546_v43, %v785_v62  ;;  %v794_v6 = vmul.f32 %v727_v36, %v399_v3  ;;  %v834_v8 = vmul.f32 %v727_v36, %v419_v4 }
  0xf5   : > { %2023 = vpow2.f32 %v1922_v61  ;;  %v1891_v9 = vmul.f32 -1.442695, %v2568_v63  ;;  %v1931_v10 = vmul.f32 -1.442695, %v2571_v0  ;;  %v2580_v11 = vadd.f32 %v2546_v43, %v825_v1  ;;  %v401_v12 = vpop.f32.mrf.mxu0  ;;  %v421_v13 = vpop.f32.mrf.mxu1 }
  0xf6   : > { %v1892_v14 = vmul.f32 -1.442695, %v2575_v5  ;;  %v2584_v15 = vadd.f32 %v2538_v37, %v794_v6  ;;  %v2587_v16 = vadd.f32 %v2538_v37, %v834_v8  ;;  %v795_v17 = vmul.f32 %v2542_v38, %v401_v12 }
  0xf7   : > { %2025 = vpow2.f32 %v1891_v9  ;;  %v1932_v18 = vmul.f32 -1.442695, %v2580_v11  ;;  %v835_v19 = vmul.f32 %v2542_v38, %v421_v13  ;;  %v403_v20 = vpop.f32.mrf.mxu0  ;;  %v423_v21 = vpop.f32.mrf.mxu1  ;;  %v734_v61 = vsub.s32 2, %v2456_v7 }
  0xf8   : > { %2027 = vpow2.f32 %v1931_v10  ;;  %v1901_v22 = vmul.f32 -1.442695, %v2584_v15  ;;  %v1941_v23 = vmul.f32 -1.442695, %v2587_v16  ;;  %v2595_v24 = vadd.f32 %v2546_v43, %v795_v17 }
  0xf9   : > { %2029 = vpow2.f32 %v1892_v14  ;;  %v2598_v25 = vadd.f32 %v2546_v43, %v835_v19  ;;  %v804_v26 = vmul.f32 %v727_v36, %v403_v20  ;;  %v844_v27 = vmul.f32 %v727_v36, %v423_v21  ;;  %v405_v28 = vpop.f32.mrf.mxu0  ;;  %v425_v29 = vpop.f32.mrf.mxu1 }
  0xfa   : > { %2031 = vpow2.f32 %v1932_v18  ;;  %v1902_v30 = vmul.f32 -1.442695, %v2595_v24  ;;  %v805_v31 = vmul.f32 %v2542_v38, %v405_v28  ;;  %v845_v39 = vmul.f32 %v2542_v38, %v425_v29 }
  0xfb   : > { %2033 = vpow2.f32 %v1901_v22  ;;  %v1942_v40 = vmul.f32 -1.442695, %v2598_v25  ;;  %v2605_v41 = vadd.f32 %v2538_v37, %v804_v26  ;;  %v2608_v42 = vadd.f32 %v2538_v37, %v844_v27  ;;  %v462_v51 = vpop.f32.mrf.mxu1  ;;  %v535_v56 = vpop.f32.mrf.mxu0 }
  0xfc   : > { %2035 = vpow2.f32 %v1941_v23  ;;  %v2611_v36 = vadd.f32 %v2546_v43, %v805_v31  ;;  %v2617_v48 = vadd.f32 %v2546_v43, %v845_v39  ;;  %v742_v3 = vsub.s32 4, %v2456_v7 }
  0xfd   : > { %2037 = vpow2.f32 %v1902_v30  ;;  %v1911_v44 = vmul.f32 -1.442695, %v2605_v41  ;;  %v1951_v45 = vmul.f32 -1.442695, %v2608_v42  ;;  %v464_v62 = vpop.f32.mrf.mxu1  ;;  %v738_v4 = vsub.s32 3, %v2456_v7  ;;  %v537_v9 = vpop.f32.mrf.mxu0 }
  0xfe   : > { %2039 = vpow2.f32 %v1942_v40  ;;  %v1912_v38 = vmul.f32 -1.442695, %v2611_v36  ;;  %v1952_v53 = vmul.f32 -1.442695, %v2617_v48  ;;  %v746_v10 = vsub.s32 5, %v2456_v7 }
  0xff   : > { %v2018_v49 = vpop.eup %2017  ;;  %2041 = vpow2.f32 %v1911_v44  ;;  %v2625_v18 = vrot.slane %v2524_v33, %v734_v61  ;;  %v466_v19 = vpop.f32.mrf.mxu1  ;;  %v2628_v22 = vrot.slane %v2524_v33, %v742_v3  ;;  %v2631_v23 = vrot.slane %v2524_v33, %v738_v4 }
 0x100   : > { %v2020_v50 = vpop.eup %2019  ;;  %2043 = vpow2.f32 %v1951_v45  ;;  %v1228_v58 = vadd.f32 1.0, %v2018_v49  ;;  %v2634_v28 = vrot.slane %v2532_v35, %v734_v61  ;;  %v2637_v29 = vrot.slane %v2524_v33, %v746_v10  ;;  %v539_v30 = vpop.f32.mrf.mxu0 }
 0x101   : > { %v2022_v37 = vpop.eup %2021  ;;  %2045 = vpow2.f32 %v1912_v38  ;;  %v1268_v13 = vadd.f32 1.0, %v2020_v50  ;;  %v2640_v40 = vrot.slane %v2532_v35, %v742_v3  ;;  %v2643_v44 = vrot.slane %v2532_v35, %v738_v4 }
 0x102   : > { %v2024_v52 = vpop.eup %2023  ;;  %v1229_v1 = vadd.f32 1.0, %v2022_v37  ;;  %2047 = vpow2.f32 %v1952_v53  ;;  %v776_v49 = vmul.f32 %v2625_v18, %v462_v51  ;;  %v2647_v50 = vrot.slane %v2532_v35, %v746_v10  ;;  %v468_v37 = vpop.f32.mrf.mxu1 }
 0x103   : > { %v1269_v21 = vadd.f32 1.0, %v2024_v52  ;;  %v779_v61 = vmul.f32 %v2637_v29, %v537_v9  ;;  %v786_v3 = vmul.f32 %v2625_v18, %v466_v19 }
 0x104   : > { %v2026_v57 = vpop.eup %2025  ;;  %v472_v4 = vpop.f32.mrf.mxu1 }
 0x105   : > { %v2028_v59 = vpop.eup %2027  ;;  %v1238_v60 = vadd.f32 1.0, %v2026_v57  ;;  %v778_v57 = vmul.f32 %v2628_v22, %v535_v56  ;;  %v788_v56 = vmul.f32 %v2628_v22, %v539_v30 }
 0x106   : > { %v2030_v43 = vpop.eup %2029  ;;  %v1278_v39 = vadd.f32 1.0, %v2028_v59 }
 0x107   : > { %v2032_v6 = vpop.eup %2031  ;;  %2049 = vrcp.f32 %v1238_v60  ;;  %v1239_v8 = vadd.f32 1.0, %v2030_v43  ;;  %v541_v43 = vpop.f32.mrf.mxu0  ;;  %v2659_v9 = vadd.f32 %v2640_v40, %v778_v57  ;;  %v2673_v30 = vadd.f32 %v2640_v40, %v788_v56 }
 0x108   : > { %v2034_v12 = vpop.eup %2033  ;;  %2051 = vrcp.f32 %v1228_v58  ;;  %v1279_v53 = vadd.f32 1.0, %v2032_v6  ;;  %v777_v58 = vmul.f32 %v2631_v23, %v464_v62  ;;  %v2654_v6 = vadd.f32 %v2634_v28, %v776_v49 }
 0x109   : > { %v2036_v14 = vpop.eup %2035  ;;  %2053 = vrcp.f32 %v1239_v8  ;;  %v1248_v17 = vadd.f32 1.0, %v2034_v12  ;;  %v787_v62 = vmul.f32 %v2631_v23, %v468_v37  ;;  %v2665_v12 = vadd.f32 %v2647_v50, %v779_v61 }
 0x10a   : > { %v2038_v20 = vpop.eup %2037  ;;  %2055 = vrcp.f32 %v1229_v1  ;;  %v1288_v59 = vadd.f32 1.0, %v2036_v14  ;;  %v2662_v10 = vadd.f32 %v2643_v44, %v777_v58  ;;  %v789_v19 = vmul.f32 %v2637_v29, %v541_v43 }
 0x10b   : > { %v2040_v26 = vpop.eup %2039  ;;  %2057 = vrcp.f32 %v1248_v17  ;;  %v1249_v27 = vadd.f32 1.0, %v2038_v20  ;;  %v796_v20 = vmul.f32 %v2625_v18, %v472_v4  ;;  %v1883_v49 = vmul.f32 -1.442695, %v2654_v6 }
 0x10c   : > { %v2042_v31 = vpop.eup %2041  ;;  %2059 = vrcp.f32 %v1268_v13  ;;  %v1289_v1 = vadd.f32 1.0, %v2040_v26  ;;  %v545_v13 = vpop.f32.mrf.mxu0  ;;  %v2670_v26 = vadd.f32 %v2634_v28, %v786_v3  ;;  %v1885_v37 = vmul.f32 -1.442695, %v2659_v9 }
 0x10d   : > { %v2044_v45 = vpop.eup %2043  ;;  %2061 = vrcp.f32 %v1249_v27  ;;  %v1258_v38 = vadd.f32 1.0, %v2042_v31  ;;  %v2676_v31 = vadd.f32 %v2643_v44, %v787_v62  ;;  %v1884_v57 = vmul.f32 -1.442695, %v2662_v10 }
 0x10e   : > { %v2046_v52 = vpop.eup %2045  ;;  %2063 = vrcp.f32 %v1269_v21  ;;  %v1298_v51 = vadd.f32 1.0, %v2044_v45  ;;  %v1886_v58 = vmul.f32 -1.442695, %v2665_v12  ;;  %v547_v3 = vpop.f32.mrf.mxu0  ;;  %v1895_v56 = vmul.f32 -1.442695, %v2673_v30 }
 0x10f   : > { %2065 = vrcp.f32 %v1258_v38  ;;  %v1259_v60 = vadd.f32 1.0, %v2046_v52  ;;  %v2048_v8 = vpop.eup %2047  ;;  %v474_v52 = vpop.f32.mrf.mxu1  ;;  %v1894_v62 = vmul.f32 -1.442695, %v2676_v31 }
 0x110   : > { %2067 = vrcp.f32 %v1278_v39  ;;  %v1299_v17 = vadd.f32 1.0, %v2048_v8  ;;  %v798_v39 = vmul.f32 %v2628_v22, %v545_v13  ;;  %v797_v13 = vmul.f32 %v2631_v23, %v474_v52 }
 0x111   : > { %2069 = vrcp.f32 %v1259_v60  ;;  %v2688_v60 = vadd.f32 %v2634_v28, %v796_v20 }
 0x112   : > { %2071 = vrcp.f32 %v1279_v53  ;;  %v2697_v8 = vadd.f32 %v2640_v40, %v798_v39 }
 0x113   : > { %2073 = vrcp.f32 %v1288_v59  ;;  %v2685_v59 = vadd.f32 %v2647_v50, %v789_v19 }
 0x114   : > { %v2050_v14 = vpop.eup %2049  ;;  %2075 = vrcp.f32 %v1289_v1 }
 0x115   : > { %v2052_v21 = vpop.eup %2051  ;;  %2077 = vrcp.f32 %v1298_v51  ;;  %v1478_v38 = vmul.f32 %v2050_v14, %v2568_v63  ;;  %v1893_v51 = vmul.f32 -1.442695, %v2670_v26  ;;  %v1896_v20 = vmul.f32 -1.442695, %v2685_v59 }
 0x116   : > { %v2054_v27 = vpop.eup %2053  ;;  %2079 = vrcp.f32 %v1299_v17  ;;  %v1468_v63 = vmul.f32 %v2052_v21, %v2549_v46  ;;  %v1903_v21 = vmul.f32 -1.442695, %v2688_v60 }
 0x117   : > { %v2056_v45 = vpop.eup %2055  ;;  %v1479_v43 = vmul.f32 %v2054_v27, %v2575_v5  ;;  %2081 = vpow2.f32 %v1883_v49  ;;  %v799_v27 = vmul.f32 %v2637_v29, %v547_v3 }
 0x118   : > { %v2058_v53 = vpop.eup %2057  ;;  %v1469_v46 = vmul.f32 %v2056_v45, %v2559_v54  ;;  %v1550_v17 = vadd.f32 %v1478_v38, %v1468_v63  ;;  %2083 = vpow2.f32 %v1885_v37  ;;  %v549_v54 = vpop.f32.mrf.mxu0  ;;  %v2708_v38 = vadd.f32 %v2643_v44, %v797_v13 }
 0x119   : > { %v2060_v61 = vpop.eup %2059  ;;  %v1488_v1 = vmul.f32 %v2058_v53, %v2584_v15  ;;  %v476_v15 = vpop.f32.mrf.mxu1  ;;  %2085 = vpow2.f32 %v1884_v57  ;;  %v808_v13 = vmul.f32 %v2628_v22, %v549_v54 }
 0x11a   : > { %v2062_v4 = vpop.eup %2061  ;;  %v1563_v53 = vadd.f32 %v1479_v43, %v1469_v46  ;;  %2087 = vpow2.f32 %v1886_v58  ;;  %v806_v49 = vmul.f32 %v2625_v18, %v476_v15  ;;  %v1508_v63 = vmul.f32 %v2060_v61, %v2552_v47  ;;  %v551_v61 = vpop.f32.mrf.mxu0 }
 0x11b   : > { %v2064_v14 = vpop.eup %2063  ;;  %v1489_v5 = vmul.f32 %v2062_v4, %v2595_v24  ;;  %v1551_v2 = vadd.f32 %v1550_v17, %v1488_v1  ;;  %v1905_v24 = vmul.f32 -1.442695, %v2697_v8  ;;  %v478_v1 = vpop.f32.mrf.mxu1  ;;  %2089 = vpow2.f32 %v1893_v51 }
 0x11c   : > { %v2066_v19 = vpop.eup %2065  ;;  %v1509_v57 = vmul.f32 %v2064_v14, %v2562_v55  ;;  %v2715_v58 = vadd.f32 %v2647_v50, %v799_v27  ;;  %2091 = vpow2.f32 %v1895_v56  ;;  %v807_v55 = vmul.f32 %v2631_v23, %v478_v1  ;;  %v555_v54 = vpop.f32.mrf.mxu0 }
 0x11d   : > { %v2068_v39 = vpop.eup %2067  ;;  %v1498_v52 = vmul.f32 %v2066_v19, %v2605_v41  ;;  %v1564_v3 = vadd.f32 %v1563_v53, %v1489_v5  ;;  %2093 = vpow2.f32 %v1894_v62  ;;  %v482_v27 = vpop.f32.mrf.mxu1  ;;  %v2725_v56 = vadd.f32 %v2634_v28, %v806_v49 }
 0x11e   : > { %v2070_v45 = vpop.eup %2069  ;;  %v1518_v17 = vmul.f32 %v2068_v39, %v2571_v0  ;;  %2095 = vpow2.f32 %v1896_v20  ;;  %v809_v20 = vmul.f32 %v2637_v29, %v551_v61  ;;  %v1906_v49 = vmul.f32 -1.442695, %v2715_v58 }
 0x11f   : > { %v2072_v37 = vpop.eup %2071  ;;  %v1552_v4 = vadd.f32 %v1551_v2, %v1498_v52  ;;  %v1499_v43 = vmul.f32 %v2070_v45, %v2611_v36  ;;  %v1904_v36 = vmul.f32 -1.442695, %v2708_v38  ;;  %2097 = vpow2.f32 %v1903_v21 }
 0x120   : > { %v2074_v41 = vpop.eup %2073  ;;  %v1519_v2 = vmul.f32 %v2072_v37, %v2580_v11  ;;  %v2728_v11 = vadd.f32 %v2640_v40, %v808_v13  ;;  %2099 = vpow2.f32 %v1905_v24  ;;  %v484_v37 = vpop.f32.mrf.mxu1 }
 0x121   : > { %v2076_v46 = vpop.eup %2075  ;;  %v1553_v15 = vadd.f32 %v1552_v4, %v1508_v63  ;;  %v1565_v19 = vadd.f32 %v1564_v3, %v1499_v43  ;;  %v1528_v51 = vmul.f32 %v2074_v41, %v2587_v16  ;;  %2101 = vpow2.f32 %v1904_v36  ;;  %v557_v13 = vpop.f32.mrf.mxu0 }
 0x122   : > { %v2078_v47 = vpop.eup %2077  ;;  %v1529_v0 = vmul.f32 %v2076_v46, %v2598_v25  ;;  %v2732_v16 = vadd.f32 %v2643_v44, %v807_v55  ;;  %v1915_v43 = vmul.f32 -1.442695, %v2728_v11  ;;  %2103 = vpow2.f32 %v1906_v49 }
 0x123   : > { %v1554_v14 = vadd.f32 %v1553_v15, %v1518_v17  ;;  %v1566_v5 = vadd.f32 %v1565_v19, %v1509_v57  ;;  %v2080_v53 = vpop.eup %2079  ;;  %v1538_v62 = vmul.f32 %v2078_v47, %v2608_v42  ;;  %v1913_v42 = vmul.f32 -1.442695, %v2725_v56  ;;  %v486_v19 = vpop.f32.mrf.mxu1 }
 0x124   : > { %v1539_v21 = vmul.f32 %v2080_v53, %v2617_v48  ;;  %v2082_v63 = vpop.eup %2081  ;;  %v1914_v41 = vmul.f32 -1.442695, %v2732_v16  ;;  %v2741_v57 = vadd.f32 %v2647_v50, %v809_v20 }
 0x125   : > { %v1555_v39 = vadd.f32 %v1554_v14, %v1528_v51  ;;  %v1567_v52 = vadd.f32 %v1566_v5, %v1519_v2  ;;  %v2084_v3 = vpop.eup %2083  ;;  %v1230_v15 = vadd.f32 1.0, %v2082_v63  ;;  %2105 = vpow2.f32 %v1913_v42 }
 0x126   : > { %v2086_v1 = vpop.eup %2085  ;;  %v1232_v47 = vadd.f32 1.0, %v2084_v3  ;;  %v816_v2 = vmul.f32 %v2625_v18, %v482_v27  ;;  %2107 = vpow2.f32 %v1915_v43  ;;  %v1916_v53 = vmul.f32 -1.442695, %v2741_v57  ;;  %v488_v27 = vpop.f32.mrf.mxu1 }
 0x127   : > { %v1556_v25 = vadd.f32 %v1555_v39, %v1538_v62  ;;  %v1568_v45 = vadd.f32 %v1567_v52, %v1529_v0  ;;  %v2088_v48 = vpop.eup %2087  ;;  %v1231_v51 = vadd.f32 1.0, %v2086_v1  ;;  %2109 = vpow2.f32 %v1914_v41  ;;  %v559_v62 = vpop.f32.mrf.mxu0 }
 0x128   : > { %v2090_v36 = vpop.eup %2089  ;;  %v1233_v5 = vadd.f32 1.0, %v2088_v48  ;;  %v818_v0 = vmul.f32 %v2628_v22, %v555_v54  ;;  %2111 = vrcp.f32 %v1230_v15  ;;  %v2748_v49 = vadd.f32 %v2634_v28, %v816_v2  ;;  %v492_v15 = vpop.f32.mrf.mxu1 }
 0x129   : > { %v1557_v4 = vrot.slane %v1556_v25, 4  ;;  %v1569_v24 = vadd.f32 %v1568_v45, %v1539_v21  ;;  %v2092_v14 = vpop.eup %2091  ;;  %2113 = vrcp.f32 %v1232_v47  ;;  %v1240_v45 = vadd.f32 1.0, %v2090_v36  ;;  %v561_v1 = vpop.f32.mrf.mxu0 }
 0x12a   : > { %v2094_v39 = vpop.eup %2093  ;;  %3309 = vst [vmem:[#allocation4_spill] sm:$0xff] %v2748_v49  ;;  %2115 = vrcp.f32 %v1231_v51  ;;  %v2751_v43 = vadd.f32 %v2640_v40, %v818_v0  ;;  %v826_v2 = vmul.f32 %v2625_v18, %v486_v19  ;;  %v828_v36 = vmul.f32 %v2628_v22, %v559_v62 }
 0x12b   : > { %v1558_v46 = vadd.f32 %v1557_v4, %v1556_v25  ;;  %v1570_v17 = vrot.slane %v1569_v24, 4  ;;  %v817_v25 = vmul.f32 %v2631_v23, %v484_v37  ;;  %v2096_v21 = vpop.eup %2095  ;;  %v1242_v4 = vadd.f32 1.0, %v2092_v14 }
 0x12c   : > { %v2098_v63 = vpop.eup %2097  ;;  %2117 = vrcp.f32 %v1233_v5  ;;  %3310 = vst [vmem:[#allocation5_spill] sm:$0xff] %v2751_v43  ;;  %v819_v37 = vmul.f32 %v2637_v29, %v557_v13  ;;  %v827_v5 = vmul.f32 %v2631_v23, %v488_v27  ;;  %v1923_v19 = vmul.f32 -1.442695, %v2748_v49 }
 0x12d   : > { %v1559_v55 = vrot.slane %v1558_v46, 2  ;;  %v1571_v61 = vadd.f32 %v1570_v17, %v1569_v24  ;;  %v2100_v54 = vpop.eup %2099  ;;  %v1241_v24 = vadd.f32 1.0, %v2094_v39  ;;  %2119 = vpow2.f32 %v1916_v53  ;;  %v565_v53 = vpop.f32.mrf.mxu0 }
 0x12e   : > { %v2102_v41 = vpop.eup %2101  ;;  %v2755_v17 = vadd.f32 %v2643_v44, %v817_v25  ;;  %2121 = vrcp.f32 %v1240_v45  ;;  %v1250_v47 = vadd.f32 1.0, %v2098_v63  ;;  %v1252_v13 = vadd.f32 1.0, %v2100_v54  ;;  %v494_v39 = vpop.f32.mrf.mxu1 }
 0x12f   : > { %v1560_v52 = vadd.f32 %v1559_v55, %v1558_v46  ;;  %v1572_v20 = vrot.slane %v1571_v61, 2  ;;  %v1243_v46 = vadd.f32 1.0, %v2096_v21  ;;  %2123 = vrcp.f32 %v1242_v4 }
 0x130   : > { %3311 = vst [vmem:[#allocation6_spill] sm:$0xff] %v2755_v17  ;;  %2125 = vrcp.f32 %v1241_v24  ;;  %v1251_v51 = vadd.f32 1.0, %v2102_v41  ;;  %v2764_v14 = vadd.f32 %v2647_v50, %v819_v37  ;;  %v829_v62 = vmul.f32 %v2637_v29, %v561_v1  ;;  %v567_v37 = vpop.f32.mrf.mxu0 }
 0x131   : > { %v1561_v42 = vrot.slane %v1560_v52, 1  ;;  %v1573_v3 = vadd.f32 %v1572_v20, %v1571_v61  ;;  %2127 = vrcp.f32 %v1243_v46  ;;  %v1925_v20 = vmul.f32 -1.442695, %v2751_v43  ;;  %v496_v46 = vpop.f32.mrf.mxu1 }
 0x132   : > { %3314 = vst [vmem:[#allocation9_spill] sm:$0xff] %v2764_v14  ;;  %2129 = vrcp.f32 %v1250_v47  ;;  %v2773_v25 = vadd.f32 %v2634_v28, %v826_v2  ;;  %v836_v21 = vmul.f32 %v2625_v18, %v492_v15  ;;  %v1924_v45 = vmul.f32 -1.442695, %v2755_v17 }
 0x133   : > { %v1574_v48 = vrot.slane %v1573_v3, 1  ;;  %v2759_v55 = vadd.f32 %v1561_v42, %v1560_v52  ;;  %v2104_v52 = vpop.eup %2103  ;;  %2131 = vrcp.f32 %v1252_v13  ;;  %v2778_v63 = vadd.f32 %v2640_v40, %v828_v36 }
 0x134   : > { %3315 = vst [vmem:[#allocation10_spill] sm:$0xff] %v2773_v25  ;;  %v2106_v27 = vpop.eup %2105  ;;  %v838_v42 = vmul.f32 %v2628_v22, %v565_v53  ;;  %2133 = vrcp.f32 %v1251_v51  ;;  %v1926_v4 = vmul.f32 -1.442695, %v2764_v14  ;;  %v2783_v54 = vadd.f32 %v2643_v44, %v827_v5 }
 0x135   : > { %3312 = vst [vmem:[#allocation7_spill] sm:$0xff] %v2759_v55  ;;  %v2761_v61 = vadd.f32 %v1574_v48, %v1573_v3  ;;  %3316 = vst [vmem:[#allocation11_spill] sm:$0xff] %v2778_v63  ;;  %v2108_v3 = vpop.eup %2107  ;;  %v837_v24 = vmul.f32 %v2631_v23, %v494_v39  ;;  %v1253_v41 = vadd.f32 1.0, %v2104_v52  ;;  %2135 = vpow2.f32 %v1923_v19 }
 0x136   : > { %3317 = vst [vmem:[#allocation12_spill] sm:$0xff] %v2783_v54  ;;  %v2110_v1 = vpop.eup %2109  ;;  %v2787_v48 = vadd.f32 %v2647_v50, %v829_v62  ;;  %2137 = vpow2.f32 %v1925_v20  ;;  %v1933_v47 = vmul.f32 -1.442695, %v2773_v25  ;;  %v2793_v2 = vadd.f32 %v2634_v28, %v836_v21  ;;  %v569_v62 = vpop.f32.mrf.mxu0 }
 0x137   : > { %3313 = vst [vmem:[#allocation8_spill] sm:$0xff] %v2761_v61  ;;  %v2789_v15 = vpop.eup %2111  ;;  %2139 = vpow2.f32 %v1924_v45  ;;  %v1935_v13 = vmul.f32 -1.442695, %v2778_v63  ;;  %v2799_v51 = vadd.f32 %v2640_v40, %v838_v42  ;;  %v1934_v53 = vmul.f32 -1.442695, %v2783_v54  ;;  %v498_v21 = vpop.f32.mrf.mxu1 }
 0x138   : > { %3318 = vst [vmem:[#allocation13_spill] sm:$0xff] %v2787_v48  ;;  %3319 = vst [vmem:[#allocation14_spill] sm:$0xff] %v2793_v2  ;;  %v2795_v36 = vpop.eup %2113  ;;  %2141 = vpow2.f32 %v1926_v4  ;;  %v2805_v19 = vadd.f32 %v2643_v44, %v837_v24  ;;  %v1936_v52 = vmul.f32 -1.442695, %v2787_v48  ;;  %v839_v20 = vmul.f32 %v2637_v29, %v567_v37  ;;  %v571_v48 = vpop.f32.mrf.mxu0 }
 0x139   : > { %3320 = vst [vmem:[#allocation15_spill] sm:$0xff] %v2799_v51  ;;  %v2801_v5 = vpop.eup %2115  ;;  %2143 = vrcp.f32 %v1253_v41  ;;  %v1943_v42 = vmul.f32 -1.442695, %v2793_v2  ;;  %v846_v4 = vmul.f32 %v2625_v18, %v496_v46  ;;  %v1945_v24 = vmul.f32 -1.442695, %v2799_v51  ;;  %v608_v46 = vpop.f32.mrf.mxu1 }
 0x13a   : > { %3321 = vst [vmem:[#allocation16_spill] sm:$0xff] %v2805_v19  ;;  %v2807_v39 = vpop.eup %2117  ;;  %2145 = vpow2.f32 %v1933_v47  ;;  %v848_v61 = vmul.f32 %v2628_v22, %v569_v62  ;;  %v1944_v41 = vmul.f32 -1.442695, %v2805_v19  ;;  %v847_v37 = vmul.f32 %v2631_v23, %v498_v21  ;;  %v681_v21 = vpop.f32.mrf.mxu0 }
 0x13b   : > { %v2120_v45 = vpop.eup %2119  ;;  %2147 = vpow2.f32 %v1935_v13  ;;  %v1260_v63 = vadd.f32 1.0, %v2106_v27  ;;  %v2824_v18 = vadd.f32 %v2647_v50, %v839_v20  ;;  %v1262_v51 = vadd.f32 1.0, %v2108_v3 }
 0x13c   : > { %v2813_v0 = vpop.eup %2121  ;;  %2149 = vpow2.f32 %v1934_v53  ;;  %v2829_v22 = vadd.f32 %v2634_v28, %v846_v4  ;;  %v1261_v62 = vadd.f32 1.0, %v2110_v1  ;;  %v2834_v23 = vadd.f32 %v2640_v40, %v848_v61  ;;  %v610_v4 = vpop.f32.mrf.mxu1 }
 0x13d   : > { %v2817_v55 = vpop.eup %2123  ;;  %2151 = vpow2.f32 %v1936_v52  ;;  %3322 = vst [vmem:[#allocation17_spill] sm:$0xff] %v2824_v18  ;;  %v1263_v52 = vadd.f32 1.0, %v2120_v45  ;;  %v2839_v20 = vadd.f32 %v2643_v44, %v847_v37  ;;  %v1946_v28 = vmul.f32 -1.442695, %v2824_v18 }
 0x13e   : > { %v2821_v47 = vpop.eup %2125  ;;  %2153 = vpow2.f32 %v1943_v42  ;;  %3323 = vst [vmem:[#allocation18_spill] sm:$0xff] %v2829_v22  ;;  %3324 = vst [vmem:[#allocation19_spill] sm:$0xff] %v2834_v23  ;;  %v849_v42 = vmul.f32 %v2637_v29, %v571_v48  ;;  %v750_v1 = vsub.s32 6, %v2456_v7  ;;  %v1953_v61 = vmul.f32 -1.442695, %v2829_v22  ;;  %v683_v48 = vpop.f32.mrf.mxu0 }
 0x13f   : > { %v2826_v13 = vpop.eup %2127  ;;  %2155 = vpow2.f32 %v1945_v24  ;;  %3325 = vst [vmem:[#allocation20_spill] sm:$0xff] %v2839_v20  ;;  %v1955_v44 = vmul.f32 -1.442695, %v2834_v23  ;;  %v721_v24 = vld [vmem:[%s3268_s2 + $0x8] sm:$0x3]  ;;  %v612_v23 = vpop.f32.mrf.mxu1 }
 0x140   : > { %v2831_v53 = vpop.eup %2129  ;;  %2157 = vpow2.f32 %v1944_v41  ;;  %v1954_v29 = vmul.f32 -1.442695, %v2839_v20  ;;  %v2871_v2 = vrot.slane %v721_v24, %v2527_v34 }
 0x141   : > { %v2836_v27 = vpop.eup %2131  ;;  %2159 = vrcp.f32 %v1260_v63  ;;  %v754_v63 = vsub.s32 7, %v2456_v7  ;;  %v2862_v7 = vrot.slane %v721_v24, %v2519_v32  ;;  %v614_v14 = vpop.f32.mrf.mxu1 }
 0x142   : > { %v2841_v3 = vpop.eup %2133  ;;  %2161 = vrcp.f32 %v1262_v51  ;;  %v2854_v51 = vadd.f32 %v2647_v50, %v849_v42  ;;  %v783_v43 = vmul.f32 %v2871_v2, %v683_v48 }
 0x143   : > { %v2136_v40 = vpop.eup %2135  ;;  %2163 = vrcp.f32 %v1261_v62  ;;  %v2857_v62 = vrot.slane %v2524_v33, %v750_v1  ;;  %v2868_v50 = vrot.slane %v2524_v33, %v754_v63 }
 0x144   : > { %v2138_v45 = vpop.eup %2137  ;;  %2165 = vrcp.f32 %v1263_v52  ;;  %v1270_v18 = vadd.f32 1.0, %v2136_v40  ;;  %3326 = vst [vmem:[#allocation21_spill] sm:$0xff] %v2854_v51  ;;  %v1956_v54 = vmul.f32 -1.442695, %v2854_v51  ;;  %v2884_v51 = vrot.slane %v2532_v35, %v754_v63 }
 0x145   : > { %v2140_v41 = vpop.eup %2139  ;;  %2167 = vpow2.f32 %v1946_v28  ;;  %v1272_v19 = vadd.f32 1.0, %v2138_v45  ;;  %v855_v28 = vld [vmem:[%s3269_s3 + $0x8] sm:$0x3]  ;;  %v790_v48 = vmul.f32 %v2857_v62, %v612_v23 }
 0x146   : > { %v2142_v37 = vpop.eup %2141  ;;  %2169 = vpow2.f32 %v1953_v61  ;;  %v1271_v20 = vadd.f32 1.0, %v2140_v41  ;;  %v685_v61 = vpop.f32.mrf.mxu0  ;;  %v2876_v41 = vrot.slane %v2532_v35, %v750_v1 }
 0x147   : > { %v2859_v22 = vpop.eup %2143  ;;  %2171 = vpow2.f32 %v1955_v44  ;;  %v1273_v40 = vadd.f32 1.0, %v2142_v37  ;;  %v780_v44 = vmul.f32 %v2857_v62, %v608_v46  ;;  %v782_v37 = vmul.f32 %v2862_v7, %v681_v21 }
 0x148   : > { %v2146_v52 = vpop.eup %2145  ;;  %2173 = vpow2.f32 %v1954_v29  ;;  %v2880_v29 = vrot.slane %v855_v28, %v2519_v32  ;;  %v687_v21 = vpop.f32.mrf.mxu0 }
 0x149   : > { %v2148_v42 = vpop.eup %2147  ;;  %2175 = vrcp.f32 %v1270_v18  ;;  %v1280_v33 = vadd.f32 1.0, %v2146_v52  ;;  %v781_v18 = vmul.f32 %v2868_v50, %v610_v4 }
 0x14a   : > { %v2150_v45 = vpop.eup %2149  ;;  %2177 = vrcp.f32 %v1272_v19  ;;  %v1282_v17 = vadd.f32 1.0, %v2148_v42  ;;  %v2888_v19 = vrot.slane %v855_v28, %v2527_v34  ;;  %v618_v42 = vpop.f32.mrf.mxu1  ;;  %v2896_v63 = vadd.f32 %v2880_v29, %v782_v37 }
 0x14b   : > { %v2152_v25 = vpop.eup %2151  ;;  %2179 = vrcp.f32 %v1271_v20  ;;  %v1281_v1 = vadd.f32 1.0, %v2150_v45  ;;  %v2891_v20 = vadd.f32 %v2876_v41, %v780_v44  ;;  %v691_v37 = vpop.f32.mrf.mxu0 }
 0x14c   : > { %v2154_v24 = vpop.eup %2153  ;;  %2181 = vrcp.f32 %v1273_v40  ;;  %v1283_v32 = vadd.f32 1.0, %v2152_v25  ;;  %3328 = vst [vmem:[#allocation23_spill] sm:$0xff] %v2896_v63  ;;  %v2902_v25 = vadd.f32 %v2884_v51, %v781_v18  ;;  %v2908_v44 = vadd.f32 %v2888_v19, %v783_v43  ;;  %v620_v18 = vpop.f32.mrf.mxu1 }
 0x14d   : > { %v2156_v46 = vpop.eup %2155  ;;  %2183 = vpow2.f32 %v1956_v54  ;;  %3327 = vst [vmem:[#allocation22_spill] sm:$0xff] %v2891_v20  ;;  %v1290_v35 = vadd.f32 1.0, %v2154_v24  ;;  %v792_v54 = vmul.f32 %v2862_v7, %v685_v61  ;;  %v793_v24 = vmul.f32 %v2871_v2, %v687_v21 }
 0x14e   : > { %v2158_v52 = vpop.eup %2157  ;;  %2185 = vrcp.f32 %v1280_v33  ;;  %v1292_v34 = vadd.f32 1.0, %v2156_v46  ;;  %3329 = vst [vmem:[#allocation24_spill] sm:$0xff] %v2902_v25  ;;  %3330 = vst [vmem:[#allocation25_spill] sm:$0xff] %v2908_v44  ;;  %v791_v33 = vmul.f32 %v2868_v50, %v614_v14  ;;  %v1889_v61 = vmul.f32 -1.442695, %v2896_v63  ;;  %v693_v63 = vpop.f32.mrf.mxu0 }
 0x14f   : > { %v2893_v4 = vpop.eup %2159  ;;  %2187 = vrcp.f32 %v1282_v17  ;;  %v1291_v45 = vadd.f32 1.0, %v2158_v52  ;;  %v1887_v17 = vmul.f32 -1.442695, %v2891_v20  ;;  %v800_v43 = vmul.f32 %v2857_v62, %v618_v42 }
 0x150   : > { %v2899_v40 = vpop.eup %2161  ;;  %2189 = vrcp.f32 %v1281_v1  ;;  %v2917_v1 = vadd.f32 %v2876_v41, %v790_v48  ;;  %v1888_v14 = vmul.f32 -1.442695, %v2902_v25  ;;  %v1890_v21 = vmul.f32 -1.442695, %v2908_v44  ;;  %v622_v25 = vpop.f32.mrf.mxu1 }
 0x151   : > { %v2905_v28 = vpop.eup %2163  ;;  %2191 = vrcp.f32 %v1283_v32  ;;  %v2922_v32 = vadd.f32 %v2880_v29, %v792_v54  ;;  %v2929_v42 = vadd.f32 %v2888_v19, %v793_v24  ;;  %v803_v24 = vmul.f32 %v2871_v2, %v693_v63 }
 0x152   : > { %v2911_v23 = vpop.eup %2165  ;;  %2193 = vrcp.f32 %v1290_v35  ;;  %3332 = vst [vmem:[#allocation27_spill] sm:$0xff] %v2917_v1  ;;  %v2926_v35 = vadd.f32 %v2884_v51, %v791_v33  ;;  %v1897_v54 = vmul.f32 -1.442695, %v2917_v1  ;;  %v801_v33 = vmul.f32 %v2868_v50, %v620_v18  ;;  %v624_v1 = vpop.f32.mrf.mxu1 }
 0x153   : > { %3331 = vst [vmem:[#allocation26_spill] sm:$0xff] %v2911_v23  ;;  %v2168_v46 = vpop.eup %2167  ;;  %2195 = vrcp.f32 %v1292_v34  ;;  %3333 = vst [vmem:[#allocation28_spill] sm:$0xff] %v2922_v32  ;;  %v802_v34 = vmul.f32 %v2862_v7, %v691_v37 }
 0x154   : > { %v2170_v52 = vpop.eup %2169  ;;  %2197 = vrcp.f32 %v1291_v45  ;;  %3334 = vst [vmem:[#allocation29_spill] sm:$0xff] %v2926_v35  ;;  %v1293_v48 = vadd.f32 1.0, %v2168_v46  ;;  %3335 = vst [vmem:[#allocation30_spill] sm:$0xff] %v2929_v42  ;;  %v2936_v45 = vadd.f32 %v2876_v41, %v800_v43  ;;  %v1898_v37 = vmul.f32 -1.442695, %v2926_v35 }
 0x155   : > { %v2172_v20 = vpop.eup %2171  ;;  %2199 = vpow2.f32 %v1887_v17  ;;  %v1899_v17 = vmul.f32 -1.442695, %v2922_v32  ;;  %v1900_v43 = vmul.f32 -1.442695, %v2929_v42  ;;  %v2950_v18 = vadd.f32 %v2880_v29, %v802_v34 }
 0x156   : > { %v2174_v49 = vpop.eup %2173  ;;  %2201 = vpow2.f32 %v1889_v61  ;;  %3337 = vst [vmem:[#allocation32_spill] sm:$0xff] %v2936_v45  ;;  %v695_v61 = vpop.f32.mrf.mxu0  ;;  %v1907_v32 = vmul.f32 -1.442695, %v2936_v45  ;;  %v2954_v63 = vadd.f32 %v2884_v51, %v801_v33 }
 0x157   : > { %v2932_v23 = vpop.eup %2175  ;;  %2203 = vpow2.f32 %v1888_v14  ;;  %3340 = vst [vmem:[#allocation35_spill] sm:$0xff] %v2950_v18  ;;  %v812_v34 = vmul.f32 %v2862_v7, %v695_v61  ;;  %v1301_v61 = vadd.f32 1.0, %v2174_v49  ;;  %v1472_v49 = vmul.f32 %v2795_v36, %v2659_v9 }
 0x158   : > { %3336 = vst [vmem:[#allocation31_spill] sm:$0xff] %v2932_v23  ;;  %v2939_v44 = vpop.eup %2177  ;;  %2205 = vpow2.f32 %v1890_v21  ;;  %3341 = vst [vmem:[#allocation36_spill] sm:$0xff] %v2954_v63  ;;  %v810_v21 = vmul.f32 %v2857_v62, %v622_v25  ;;  %v697_v45 = vpop.f32.mrf.mxu0  ;;  %v1909_v25 = vmul.f32 -1.442695, %v2950_v18  ;;  %v1481_v9 = vmul.f32 %v2821_v47, %v2676_v31 }
 0x159   : > { %v2943_v46 = vpop.eup %2179  ;;  %2207 = vrcp.f32 %v1293_v48  ;;  %v2960_v48 = vadd.f32 %v2888_v19, %v803_v24 }
 0x15a   : > { %3338 = vst [vmem:[#allocation33_spill] sm:$0xff] %v2943_v46  ;;  %v2946_v23 = vpop.eup %2181  ;;  %2209 = vpow2.f32 %v1897_v54  ;;  %v1300_v46 = vadd.f32 1.0, %v2170_v52  ;;  %v811_v54 = vmul.f32 %v2868_v50, %v624_v1  ;;  %v1908_v52 = vmul.f32 -1.442695, %v2954_v63  ;;  %v701_v63 = vpop.f32.mrf.mxu0 }
 0x15b   : > { %3339 = vst [vmem:[#allocation34_spill] sm:$0xff] %v2946_v23  ;;  %v2184_v14 = vpop.eup %2183  ;;  %2211 = vpow2.f32 %v1899_v17  ;;  %3343 = vst [vmem:[#allocation38_spill] sm:$0xff] %v2960_v48  ;;  %v1302_v23 = vadd.f32 1.0, %v2172_v20  ;;  %v2973_v17 = vadd.f32 %v2876_v41, %v810_v21  ;;  %v1910_v20 = vmul.f32 -1.442695, %v2960_v48 }
 0x15c   : > { %v2957_v35 = vpop.eup %2185  ;;  %2213 = vpow2.f32 %v1898_v37  ;;  %v2979_v1 = vadd.f32 %v2880_v29, %v812_v34  ;;  %v1303_v21 = vadd.f32 1.0, %v2184_v14  ;;  %v1470_v34 = vmul.f32 %v2789_v15, %v2654_v6 }
 0x15d   : > { %3342 = vst [vmem:[#allocation37_spill] sm:$0xff] %v2957_v35  ;;  %v2963_v42 = vpop.eup %2187  ;;  %2215 = vpow2.f32 %v1900_v43  ;;  %3345 = vst [vmem:[#allocation40_spill] sm:$0xff] %v2973_v17  ;;  %v2984_v43 = vadd.f32 %v2884_v51, %v811_v54  ;;  %v1917_v48 = vmul.f32 -1.442695, %v2973_v17  ;;  %v1471_v54 = vmul.f32 %v2801_v5, %v2662_v10  ;;  %v703_v17 = vpop.f32.mrf.mxu0 }
 0x15e   : > { %v2966_v33 = vpop.eup %2189  ;;  %2217 = vpow2.f32 %v1907_v32  ;;  %v628_v32 = vpop.f32.mrf.mxu1  ;;  %v1919_v14 = vmul.f32 -1.442695, %v2979_v1  ;;  %v1482_v6 = vmul.f32 %v2817_v55, %v2673_v30  ;;  %v1483_v30 = vmul.f32 %v2826_v13, %v2685_v59 }
 0x15f   : > { %v2969_v35 = vpop.eup %2191  ;;  %2219 = vrcp.f32 %v1300_v46  ;;  %3347 = vst [vmem:[#allocation42_spill] sm:$0xff] %v2984_v43  ;;  %v813_v46 = vmul.f32 %v2871_v2, %v697_v45  ;;  %v1480_v45 = vmul.f32 %v2813_v0, %v2670_v26  ;;  %v1918_v15 = vmul.f32 -1.442695, %v2984_v43 }
 0x160   : > { %3344 = vst [vmem:[#allocation39_spill] sm:$0xff] %v2969_v35  ;;  %v2975_v24 = vpop.eup %2193  ;;  %2221 = vrcp.f32 %v1302_v23  ;;  %v1473_v26 = vmul.f32 %v2807_v39, %v2665_v12  ;;  %v820_v47 = vmul.f32 %v2857_v62, %v628_v32  ;;  %v705_v39 = vpop.f32.mrf.mxu0  ;;  %v1602_v59 = vadd.f32 %v1482_v6, %v1472_v49 }
 0x161   : > { %v2981_v37 = vpop.eup %2195  ;;  %2223 = vpow2.f32 %v1909_v25  ;;  %v3005_v36 = vadd.f32 %v2888_v19, %v813_v46  ;;  %v822_v46 = vmul.f32 %v2862_v7, %v701_v63  ;;  %v1589_v13 = vadd.f32 %v1481_v9, %v1471_v54 }
 0x162   : > { %3346 = vst [vmem:[#allocation41_spill] sm:$0xff] %v2981_v37  ;;  %v2986_v18 = vpop.eup %2197  ;;  %2225 = vpow2.f32 %v1908_v52  ;;  %v630_v52 = vpop.f32.mrf.mxu1  ;;  %v3021_v63 = vadd.f32 %v2876_v41, %v820_v47 }
 0x163   : > { %v2200_v35 = vpop.eup %2199  ;;  %2227 = vpow2.f32 %v1910_v20  ;;  %v1490_v20 = vmul.f32 %v2831_v53, %v2688_v60  ;;  %v1615_v60 = vadd.f32 %v1483_v30, %v1473_v26  ;;  %v1492_v53 = vmul.f32 %v2836_v27, %v2697_v8  ;;  %v707_v8 = vpop.f32.mrf.mxu0 }
 0x164   : > { %v2202_v23 = vpop.eup %2201  ;;  %2229 = vrcp.f32 %v1301_v61  ;;  %v1234_v10 = vadd.f32 1.0, %v2200_v35  ;;  %v1576_v61 = vadd.f32 %v1480_v45, %v1470_v34  ;;  %v632_v12 = vpop.f32.mrf.mxu1  ;;  %v3026_v54 = vadd.f32 %v2880_v29, %v822_v46 }
 0x165   : > { %v2204_v25 = vpop.eup %2203  ;;  %2231 = vrcp.f32 %v1303_v21  ;;  %v1236_v55 = vadd.f32 1.0, %v2202_v23  ;;  %v821_v45 = vmul.f32 %v2868_v50, %v630_v52  ;;  %v1603_v30 = vadd.f32 %v1602_v59, %v1492_v53 }
 0x166   : > { %v2206_v37 = vpop.eup %2205  ;;  %2233 = vpow2.f32 %v1917_v48  ;;  %v1235_v31 = vadd.f32 1.0, %v2204_v25  ;;  %v1920_v48 = vmul.f32 -1.442695, %v3005_v36  ;;  %v634_v6 = vpop.f32.mrf.mxu1  ;;  %v1493_v52 = vmul.f32 %v2859_v22, %v2715_v58 }
 0x167   : > { %v3007_v5 = vpop.eup %2207  ;;  %2235 = vpow2.f32 %v1919_v14  ;;  %v1237_v21 = vadd.f32 1.0, %v2206_v37  ;;  %v1577_v37 = vadd.f32 %v1576_v61, %v1490_v20  ;;  %v1927_v20 = vmul.f32 -1.442695, %v3021_v63  ;;  %v711_v61 = vpop.f32.mrf.mxu0 }
 0x168   : > { %v2210_v0 = vpop.eup %2209  ;;  %2237 = vpow2.f32 %v1918_v15  ;;  %v1491_v15 = vmul.f32 %v2841_v3, %v2708_v38  ;;  %v1500_v3 = vmul.f32 %v2893_v4, %v2725_v56  ;;  %v3043_v47 = vadd.f32 %v2884_v51, %v821_v45 }
 0x169   : > { %v2212_v35 = vpop.eup %2211  ;;  %2239 = vrcp.f32 %v1234_v10  ;;  %v1244_v32 = vadd.f32 1.0, %v2210_v0  ;;  %v823_v10 = vmul.f32 %v2871_v2, %v703_v17  ;;  %v1929_v17 = vmul.f32 -1.442695, %v3026_v54 }
 0x16a   : > { %v2214_v43 = vpop.eup %2213  ;;  %2241 = vrcp.f32 %v1236_v55  ;;  %v1246_v14 = vadd.f32 1.0, %v2212_v35  ;;  %v830_v55 = vmul.f32 %v2857_v62, %v632_v12  ;;  %v638_v35 = vpop.f32.mrf.mxu1  ;;  %v831_v46 = vmul.f32 %v2868_v50, %v634_v6 }
 0x16b   : > { %v2216_v23 = vpop.eup %2215  ;;  %2243 = vrcp.f32 %v1235_v31  ;;  %v1245_v49 = vadd.f32 1.0, %v2214_v43  ;;  %v832_v31 = vmul.f32 %v2862_v7, %v705_v39  ;;  %v3048_v22 = vadd.f32 %v2888_v19, %v823_v10  ;;  %v713_v6 = vpop.f32.mrf.mxu0 }
 0x16c   : > { %v2218_v34 = vpop.eup %2217  ;;  %2245 = vrcp.f32 %v1237_v21  ;;  %v1247_v9 = vadd.f32 1.0, %v2216_v23  ;;  %v3054_v4 = vadd.f32 %v2876_v41, %v830_v55  ;;  %v833_v39 = vmul.f32 %v2871_v2, %v707_v8  ;;  %v640_v45 = vpop.f32.mrf.mxu1 }
 0x16d   : > { %v3023_v25 = vpop.eup %2219  ;;  %2247 = vpow2.f32 %v1920_v48  ;;  %v1254_v43 = vadd.f32 1.0, %v2218_v34  ;;  %v1590_v48 = vadd.f32 %v1589_v13, %v1491_v15  ;;  %v3058_v53 = vadd.f32 %v2880_v29, %v832_v31 }
 0x16e   : > { %v3029_v27 = vpop.eup %2221  ;;  %2249 = vrcp.f32 %v1244_v32  ;;  %v3060_v34 = vadd.f32 %v1615_v60, %v1493_v52  ;;  %v1578_v8 = vadd.f32 %v1577_v37, %v1500_v3  ;;  %v1930_v13 = vmul.f32 -1.442695, %v3048_v22  ;;  %v715_v3 = vpop.f32.mrf.mxu0 }
 0x16f   : > { %v2224_v26 = vpop.eup %2223  ;;  %2251 = vrcp.f32 %v1246_v14  ;;  %v1502_v14 = vmul.f32 %v2899_v40, %v2728_v11  ;;  %v3067_v15 = vadd.f32 %v2884_v51, %v831_v46  ;;  %v1937_v60 = vmul.f32 -1.442695, %v3054_v4 }
 0x170   : > { %v2226_v0 = vpop.eup %2225  ;;  %2253 = vrcp.f32 %v1245_v49  ;;  %v1256_v58 = vadd.f32 1.0, %v2224_v26  ;;  %v1928_v49 = vmul.f32 -1.442695, %v3043_v47  ;;  %v3073_v11 = vadd.f32 %v2888_v19, %v833_v39 }
 0x171   : > { %v2228_v38 = vpop.eup %2227  ;;  %2255 = vrcp.f32 %v1247_v9  ;;  %v1255_v56 = vadd.f32 1.0, %v2226_v0  ;;  %v840_v40 = vmul.f32 %v2857_v62, %v638_v35  ;;  %v1501_v37 = vmul.f32 %v2905_v28, %v2732_v16 }
 0x172   : > { %v3045_v21 = vpop.eup %2229  ;;  %2257 = vrcp.f32 %v1254_v43  ;;  %v1257_v23 = vadd.f32 1.0, %v2228_v38  ;;  %v1939_v43 = vmul.f32 -1.442695, %v3058_v53  ;;  %v842_v55 = vmul.f32 %v2862_v7, %v711_v61  ;;  %v642_v38 = vpop.f32.mrf.mxu1 }
 0x173   : > { %v3051_v12 = vpop.eup %2231  ;;  %2259 = vpow2.f32 %v1927_v20  ;;  %v1604_v52 = vadd.f32 %v1603_v30, %v1502_v14  ;;  %v3085_v31 = vadd.f32 %v2876_v41, %v840_v40  ;;  %v1938_v16 = vmul.f32 -1.442695, %v3067_v15  ;;  %v3349_v30 = vld [vmem:[#allocation26_spill] sm:$0xff] }
 0x174   : > { %v2234_v59 = vpop.eup %2233  ;;  %2261 = vpow2.f32 %v1929_v17  ;;  %v3091_v28 = vadd.f32 %v2880_v29, %v842_v55  ;;  %v841_v35 = vmul.f32 %v2868_v50, %v640_v45  ;;  %v1940_v46 = vmul.f32 -1.442695, %v3073_v11  ;;  %v644_v40 = vpop.f32.mrf.mxu1 }
 0x175   : > { %v2236_v32 = vpop.eup %2235  ;;  %2263 = vrcp.f32 %v1256_v58  ;;  %v1264_v20 = vadd.f32 1.0, %v2234_v59  ;;  %v1503_v58 = vmul.f32 %v3349_v30, %v2741_v57  ;;  %v3350_v59 = vld [vmem:[#allocation4_spill] sm:$0xff]  ;;  %v1947_v57 = vmul.f32 -1.442695, %v3085_v31  ;;  %v717_v55 = vpop.f32.mrf.mxu0 }
 0x176   : > { %v2238_v9 = vpop.eup %2237  ;;  %2265 = vrcp.f32 %v1255_v56  ;;  %3348 = vst [vmem:[#allocation43_spill] sm:$0xff] %v3091_v28  ;;  %v843_v56 = vmul.f32 %v2871_v2, %v713_v6  ;;  %v850_v6 = vmul.f32 %v2857_v62, %v642_v38 }
 0x177   : > { %v3069_v10 = vpop.eup %2239  ;;  %2267 = vrcp.f32 %v1257_v23  ;;  %v3351_v23 = vld [vmem:[#allocation31_spill] sm:$0xff] }
 0x178   : > { %v3076_v26 = vpop.eup %2241  ;;  %2269 = vpow2.f32 %v1928_v49  ;;  %v1510_v14 = vmul.f32 %v3351_v23, %v3350_v59  ;;  %v1266_v49 = vadd.f32 1.0, %v2236_v32  ;;  %v1591_v59 = vadd.f32 %v1590_v48, %v1501_v37 }
 0x179   : > { %v3082_v0 = vpop.eup %2243  ;;  %2271 = vpow2.f32 %v1930_v13  ;;  %v3103_v13 = vadd.f32 %v2884_v51, %v841_v35  ;;  %v1949_v32 = vmul.f32 -1.442695, %v3091_v28  ;;  %v3122_v62 = vadd.f32 %v2876_v41, %v850_v6 }
 0x17a   : > { %v3087_v17 = vpop.eup %2245  ;;  %2273 = vpow2.f32 %v1937_v60  ;;  %v3109_v60 = vadd.f32 %v2888_v19, %v843_v56  ;;  %v851_v37 = vmul.f32 %v2868_v50, %v644_v40  ;;  %v1579_v28 = vadd.f32 %v1578_v8, %v1510_v14  ;;  %v3357_v8 = vld [vmem:[#allocation10_spill] sm:$0xff] }
 0x17b   : > { %v2248_v61 = vpop.eup %2247  ;;  %2275 = vpow2.f32 %v1939_v43  ;;  %3352 = vst [vmem:[#allocation26_spill] sm:$0xff] %v3103_v13  ;;  %v852_v43 = vmul.f32 %v2862_v7, %v715_v3  ;;  %v1948_v56 = vmul.f32 -1.442695, %v3103_v13  ;;  %v853_v7 = vmul.f32 %v2871_v2, %v717_v55  ;;  %v3356_v13 = vld [vmem:[#allocation33_spill] sm:$0xff]  ;;  %v3361_v55 = vld [vmem:[#allocation12_spill] sm:$0xff] }
 0x17c   : > { %v3098_v39 = vpop.eup %2249  ;;  %2277 = vrcp.f32 %v1264_v20  ;;  %3353 = vst [vmem:[#allocation4_spill] sm:$0xff] %v3109_v60  ;;  %v3354_v20 = vld [vmem:[#allocation5_spill] sm:$0xff]  ;;  %v1950_v48 = vmul.f32 -1.442695, %v3109_v60  ;;  %v1267_v6 = vadd.f32 1.0, %v2248_v61 }
 0x17d   : > { %v3105_v45 = vpop.eup %2251  ;;  %2279 = vpow2.f32 %v1938_v16  ;;  %v1512_v23 = vmul.f32 %v2939_v44, %v3354_v20  ;;  %v1617_v16 = vadd.f32 %v3060_v34, %v1503_v58  ;;  %v1265_v44 = vadd.f32 1.0, %v2238_v9  ;;  %v3355_v20 = vld [vmem:[#allocation6_spill] sm:$0xff]  ;;  %v3358_v58 = vld [vmem:[#allocation37_spill] sm:$0xff] }
 0x17e   : > { %v3112_v30 = vpop.eup %2253  ;;  %2281 = vpow2.f32 %v1940_v46  ;;  %v1511_v41 = vmul.f32 %v3356_v13, %v3355_v20  ;;  %v1957_v2 = vmul.f32 -1.442695, %v3122_v62  ;;  %v3139_v34 = vadd.f32 %v2884_v51, %v851_v37  ;;  %v3364_v20 = vld [vmem:[#allocation16_spill] sm:$0xff] }
 0x17f   : > { %v3116_v35 = vpop.eup %2255  ;;  %2283 = vrcp.f32 %v1266_v49  ;;  %v3133_v49 = vadd.f32 %v2880_v29, %v852_v43  ;;  %v1605_v50 = vadd.f32 %v1604_v52, %v1512_v23  ;;  %v1520_v14 = vmul.f32 %v3358_v58, %v3357_v8  ;;  %v3360_v52 = vld [vmem:[#allocation34_spill] sm:$0xff] }
 0x180   : > { %v3124_v38 = vpop.eup %2257  ;;  %2285 = vpow2.f32 %v1947_v57  ;;  %v3146_v61 = vadd.f32 %v2888_v19, %v853_v7  ;;  %v3359_v57 = vld [vmem:[#allocation9_spill] sm:$0xff]  ;;  %v1592_v23 = vadd.f32 %v1591_v59, %v1511_v41  ;;  %v3363_v7 = vld [vmem:[#allocation11_spill] sm:$0xff]  ;;  %v1531_v8 = vmul.f32 %v2986_v18, %v3364_v20  ;;  %v3365_v58 = vld [vmem:[#allocation18_spill] sm:$0xff] }
 0x181   : > { %v2260_v3 = vpop.eup %2259  ;;  %2287 = vpow2.f32 %v1949_v32  ;;  %v1513_v40 = vmul.f32 %v3360_v52, %v3359_v57  ;;  %v1521_v32 = vmul.f32 %v2966_v33, %v3361_v55  ;;  %v1958_v33 = vmul.f32 -1.442695, %v3139_v34  ;;  %v3366_v57 = vld [vmem:[#allocation20_spill] sm:$0xff] }
 0x182   : > { %v2262_v46 = vpop.eup %2261  ;;  %2289 = vpow2.f32 %v1948_v56  ;;  %v1274_v13 = vadd.f32 1.0, %v2260_v3  ;;  %v3362_v56 = vld [vmem:[#allocation14_spill] sm:$0xff]  ;;  %v1522_v3 = vmul.f32 %v2963_v42, %v3363_v7  ;;  %v1540_v59 = vmul.f32 %v3023_v25, %v3365_v58 }
 0x183   : > { %v3135_v60 = vpop.eup %2263  ;;  %2291 = vpow2.f32 %v1950_v48  ;;  %v1276_v51 = vadd.f32 1.0, %v2262_v46  ;;  %v1530_v37 = vmul.f32 %v2975_v24, %v3362_v56  ;;  %v1959_v48 = vmul.f32 -1.442695, %v3133_v49  ;;  %v3368_v56 = vld [vmem:[#allocation41_spill] sm:$0xff] }
 0x184   : > { %v3141_v9 = vpop.eup %2265  ;;  %2293 = vrcp.f32 %v1265_v44  ;;  %v1580_v46 = vadd.f32 %v1579_v28, %v1520_v14  ;;  %v1960_v24 = vmul.f32 -1.442695, %v3146_v61  ;;  %v1541_v52 = vmul.f32 %v3045_v21, %v3366_v57 }
 0x185   : > { %v3148_v29 = vpop.eup %2267  ;;  %2295 = vrcp.f32 %v1267_v6  ;;  %v1593_v6 = vadd.f32 %v1592_v23, %v1521_v32  ;;  %v1606_v25 = vadd.f32 %v1605_v50, %v1522_v3  ;;  %v3369_v23 = vld [vmem:[#allocation19_spill] sm:$0xff] }
 0x186   : > { %v2270_v43 = vpop.eup %2269  ;;  %2297 = vpow2.f32 %v1957_v2  ;;  %v1581_v18 = vadd.f32 %v1580_v46, %v1530_v37  ;;  %v3367_v2 = vld [vmem:[#allocation15_spill] sm:$0xff]  ;;  %v1542_v21 = vmul.f32 %v3029_v27, %v3369_v23  ;;  %v1618_v37 = vadd.f32 %v1617_v16, %v1513_v40 }
 0x187   : > { %v2272_v19 = vpop.eup %2271  ;;  %2299 = vrcp.f32 %v1274_v13  ;;  %v1275_v42 = vadd.f32 1.0, %v2270_v43  ;;  %v1532_v7 = vmul.f32 %v3368_v56, %v3367_v2  ;;  %v1594_v13 = vadd.f32 %v1593_v6, %v1531_v8 }
 0x188   : > { %v2274_v44 = vpop.eup %2273  ;;  %2301 = vrcp.f32 %v1276_v51  ;;  %v1277_v28 = vadd.f32 1.0, %v2272_v19  ;;  %v1582_v32 = vadd.f32 %v1581_v18, %v1540_v59  ;;  %v3370_v19 = vld [vmem:[#allocation13_spill] sm:$0xff] }
 0x189   : > { %v2276_v41 = vpop.eup %2275  ;;  %2303 = vpow2.f32 %v1959_v48  ;;  %v1284_v20 = vadd.f32 1.0, %v2274_v44  ;;  %v1595_v46 = vadd.f32 %v1594_v13, %v1541_v52  ;;  %v3371_v48 = vld [vmem:[#allocation39_spill] sm:$0xff]  ;;  %v1607_v50 = vadd.f32 %v1606_v25, %v1532_v7  ;;  %v3373_v7 = vld [vmem:[#allocation21_spill] sm:$0xff] }
 0x18a   : > { %v3167_v55 = vpop.eup %2277  ;;  %2305 = vpow2.f32 %v1958_v33  ;;  %v1286_v51 = vadd.f32 1.0, %v2276_v41  ;;  %v1523_v2 = vmul.f32 %v3371_v48, %v3370_v19  ;;  %v3372_v33 = vld [vmem:[#allocation17_spill] sm:$0xff]  ;;  %v1583_v41 = vrot.slane %v1582_v32, 4 }
 0x18b   : > { %v2280_v14 = vpop.eup %2279  ;;  %2307 = vpow2.f32 %v1960_v24  ;;  %v1533_v44 = vmul.f32 %v3007_v5, %v3372_v33  ;;  %v1608_v6 = vadd.f32 %v1607_v50, %v1542_v21  ;;  %v1596_v52 = vrot.slane %v1595_v46, 4  ;;  %v3375_v33 = vld [vmem:[#allocation22_spill] sm:$0xff] }
 0x18c   : > { %v2282_v58 = vpop.eup %2281  ;;  %2309 = vrcp.f32 %v1275_v42  ;;  %v1285_v3 = vadd.f32 1.0, %v2280_v14  ;;  %v1619_v56 = vadd.f32 %v1618_v37, %v1523_v2 }
 0x18d   : > { %v3173_v43 = vpop.eup %2283  ;;  %2311 = vrcp.f32 %v1277_v28  ;;  %v1287_v27 = vadd.f32 1.0, %v2282_v58  ;;  %v1543_v28 = vmul.f32 %v3051_v12, %v3373_v7  ;;  %v1609_v58 = vrot.slane %v1608_v6, 4  ;;  %v3374_v12 = vld [vmem:[#allocation27_spill] sm:$0xff] }
 0x18e   : > { %v2286_v57 = vpop.eup %2285  ;;  %2313 = vrcp.f32 %v1284_v20  ;;  %v1620_v13 = vadd.f32 %v1619_v56, %v1533_v44  ;;  %v3181_v20 = vadd.f32 %v1583_v41, %v1582_v32  ;;  %v3183_v21 = vadd.f32 %v1596_v52, %v1595_v46  ;;  %v3378_v56 = vld [vmem:[#allocation29_spill] sm:$0xff] }
 0x18f   : > { %v2288_v8 = vpop.eup %2287  ;;  %v1294_v59 = vadd.f32 1.0, %v2286_v57  ;;  %2315 = vrcp.f32 %v1286_v51  ;;  %v1484_v48 = vmul.f32 %v3098_v39, %v3374_v12  ;;  %v3188_v32 = vadd.f32 %v1609_v58, %v1608_v6  ;;  %v3377_v39 = vld [vmem:[#allocation28_spill] sm:$0xff] }
 0x190   : > { %v2290_v24 = vpop.eup %2289  ;;  %v1296_v16 = vadd.f32 1.0, %v2288_v8  ;;  %v1621_v37 = vadd.f32 %v1620_v13, %v1543_v28  ;;  %v1585_v50 = vrot.slane %v3181_v20, 2  ;;  %v1598_v46 = vrot.slane %v3183_v21, 2  ;;  %v3379_v28 = vld [vmem:[#allocation40_spill] sm:$0xff]  ;;  %v3381_v13 = vld [vmem:[#allocation30_spill] sm:$0xff] }
 0x191   : > { %v2292_v40 = vpop.eup %2291  ;;  %2317 = vrcp.f32 %v1294_v59  ;;  %v1295_v42 = vadd.f32 1.0, %v2290_v24  ;;  %v1474_v44 = vmul.f32 %v3069_v10, %v3375_v33  ;;  %v1485_v7 = vmul.f32 %v3112_v30, %v3378_v56  ;;  %v3383_v12 = vld [vmem:[#allocation24_spill] sm:$0xff]  ;;  %v3385_v33 = vld [vmem:[#allocation25_spill] sm:$0xff] }
 0x192   : > { %v2294_v18 = vpop.eup %2293  ;;  %2319 = vrcp.f32 %v1285_v3  ;;  %v1297_v14 = vadd.f32 1.0, %v2292_v40  ;;  %v1486_v40 = vmul.f32 %v3105_v45, %v3377_v39  ;;  %v1487_v58 = vmul.f32 %v3116_v35, %v3381_v13  ;;  %v3386_v35 = vld [vmem:[#allocation38_spill] sm:$0xff] }
 0x193   : > { %v2296_v5 = vpop.eup %2295  ;;  %2321 = vrcp.f32 %v1287_v27  ;;  %v3376_v27 = vld [vmem:[#allocation32_spill] sm:$0xff] }
 0x194   : > { %v2298_v25 = vpop.eup %2297  ;;  %2323 = vrcp.f32 %v1296_v16  ;;  %v1494_v59 = vmul.f32 %v3124_v38, %v3376_v27  ;;  %v1622_v16 = vrot.slane %v1621_v37, 4  ;;  %v1497_v27 = vmul.f32 %v3148_v29, %v3386_v35 }
 0x195   : > { %v2300_v23 = vpop.eup %2299  ;;  %2325 = vrcp.f32 %v1295_v42  ;;  %v1304_v51 = vadd.f32 1.0, %v2298_v25  ;;  %v1628_v42 = vadd.f32 %v1484_v48, %v1474_v44  ;;  %v3380_v25 = vld [vmem:[#allocation23_spill] sm:$0xff]  ;;  %v1475_v48 = vmul.f32 %v3082_v0, %v3383_v12  ;;  %v3389_v12 = vld [vmem:[#allocation26_spill] sm:$0xff] }
 0x196   : > { %v2302_v57 = vpop.eup %2301  ;;  %2327 = vrcp.f32 %v1297_v14  ;;  %v1504_v14 = vmul.f32 %v3167_v55, %v3379_v28  ;;  %v1476_v38 = vmul.f32 %v3076_v26, %v3380_v25  ;;  %v1477_v26 = vmul.f32 %v3087_v17, %v3385_v33 }
 0x197   : > { %v2304_v19 = vpop.eup %2303  ;;  %2329 = vrcp.f32 %v1304_v51  ;;  %v3382_v51 = vld [vmem:[#allocation35_spill] sm:$0xff]  ;;  %v1629_v30 = vadd.f32 %v1628_v42, %v1494_v59  ;;  %v1641_v39 = vadd.f32 %v1485_v7, %v1475_v48  ;;  %v3387_v59 = vld [vmem:[#allocation42_spill] sm:$0xff]  ;;  %v1507_v56 = vmul.f32 %v2296_v5, %v3005_v36 }
 0x198   : > { %v2306_v2 = vpop.eup %2305  ;;  %v1306_v3 = vadd.f32 1.0, %v2304_v19  ;;  %v1496_v45 = vmul.f32 %v3135_v60, %v3382_v51  ;;  %v1654_v44 = vadd.f32 %v1486_v40, %v1476_v38  ;;  %v1506_v60 = vmul.f32 %v3173_v43, %v2979_v1 }
 0x199   : > { %v2308_v8 = vpop.eup %2307  ;;  %v1305_v24 = vadd.f32 1.0, %v2306_v2  ;;  %v3384_v2 = vld [vmem:[#allocation36_spill] sm:$0xff]  ;;  %v1630_v0 = vadd.f32 %v1629_v30, %v1504_v14  ;;  %v1516_v17 = vmul.f32 %v2302_v57, %v3026_v54  ;;  %v1623_v38 = vadd.f32 %v1622_v16, %v1621_v37 }
 0x19a   : > { %v2310_v41 = vpop.eup %2309  ;;  %2331 = vrcp.f32 %v1306_v3  ;;  %v1307_v52 = vadd.f32 1.0, %v2308_v8  ;;  %v1495_v55 = vmul.f32 %v3141_v9, %v3384_v2  ;;  %v1514_v3 = vmul.f32 %v2300_v23, %v3021_v63  ;;  %v3390_v37 = vld [vmem:[#allocation4_spill] sm:$0xff] }
 0x19b   : > { %v2312_v6 = vpop.eup %2311  ;;  %2333 = vrcp.f32 %v1305_v24  ;;  %v1667_v63 = vadd.f32 %v1487_v58, %v1477_v26  ;;  %v1655_v23 = vadd.f32 %v1654_v44, %v1496_v45  ;;  %v1515_v25 = vmul.f32 %v2310_v41, %v3043_v47  ;;  %v3388_v41 = vld [vmem:[#allocation43_spill] sm:$0xff] }
 0x19c   : > { %v2314_v10 = vpop.eup %2313  ;;  %2335 = vrcp.f32 %v1307_v52  ;;  %v1505_v52 = vmul.f32 %v2294_v18, %v3387_v59  ;;  %v1642_v28 = vadd.f32 %v1641_v39, %v1495_v55  ;;  %v1631_v29 = vadd.f32 %v1630_v0, %v1514_v3 }
 0x19d   : > { %v2316_v19 = vpop.eup %2315  ;;  %v1524_v9 = vmul.f32 %v2314_v10, %v3054_v4  ;;  %v1668_v7 = vadd.f32 %v1667_v63, %v1497_v27  ;;  %v1656_v14 = vadd.f32 %v1655_v23, %v1506_v60  ;;  %v1517_v18 = vmul.f32 %v2312_v6, %v3048_v22 }
 0x19e   : > { %v2318_v8 = vpop.eup %2317  ;;  %v1526_v4 = vmul.f32 %v2316_v19, %v3058_v53  ;;  %v1643_v13 = vadd.f32 %v1642_v28, %v1505_v52  ;;  %v1624_v30 = vrot.slane %v1623_v38, 2  ;;  %v1611_v3 = vrot.slane %v3188_v32, 2 }
 0x19f   : > { %v2320_v24 = vpop.eup %2319  ;;  %v1534_v1 = vmul.f32 %v2318_v8, %v3085_v31  ;;  %v1632_v36 = vadd.f32 %v1631_v29, %v1524_v9  ;;  %v1669_v57 = vadd.f32 %v1668_v7, %v1507_v56  ;;  %v1657_v58 = vadd.f32 %v1656_v14, %v1516_v17 }
 0x1a0   : > { %v2322_v42 = vpop.eup %2321  ;;  %v1525_v54 = vmul.f32 %v2320_v24, %v3067_v15  ;;  %v1644_v51 = vadd.f32 %v1643_v13, %v1515_v25  ;;  %v1599_v15 = vadd.f32 %v1598_v46, %v3183_v21  ;;  %v1586_v44 = vadd.f32 %v1585_v50, %v3181_v20 }
 0x1a1   : > { %v2324_v40 = vpop.eup %2323  ;;  %v1527_v47 = vmul.f32 %v2322_v42, %v3073_v11  ;;  %v1633_v45 = vadd.f32 %v1632_v36, %v1534_v1  ;;  %v1670_v53 = vadd.f32 %v1669_v57, %v1517_v18  ;;  %v1658_v6 = vadd.f32 %v1657_v58, %v1526_v4  ;;  %v3391_v57 = vld [vmem:[#allocation3_spill] sm:$0xff] }
 0x1a2   : > { %v2326_v43 = vpop.eup %2325  ;;  %v1536_v31 = vmul.f32 %v2324_v40, %v3388_v41  ;;  %v1645_v2 = vadd.f32 %v1644_v51, %v1525_v54  ;;  %v1600_v39 = vrot.slane %v1599_v15, 1  ;;  %v1625_v0 = vadd.f32 %v1624_v30, %v1623_v38 }
 0x1a3   : > { %v2328_v10 = vpop.eup %2327  ;;  %v1535_v48 = vmul.f32 %v2326_v43, %v3389_v12  ;;  %v1671_v8 = vadd.f32 %v1670_v53, %v1527_v47  ;;  %v2380_v9 = vmov 1966171168   ;;  %v1587_v23 = vrot.slane %v1586_v44, 1 }
 0x1a4   : > { %v2330_v5 = vpop.eup %2329  ;;  %v1537_v16 = vmul.f32 %v2328_v10, %v3390_v37  ;;  %v1659_v33 = vadd.f32 %v1658_v6, %v1536_v31  ;;  %v1695_v42 = vunpack.c.l.s4 %v2380_v9  ;;  %v1612_v56 = vadd.f32 %v1611_v3, %v3188_v32  ;;  %v3392_v6 = vld [vmem:[#allocation7_spill] sm:$0xff]  ;;  %v3393_v37 = vld [vmem:[#allocation8_spill] sm:$0xff] }
 0x1a5   : > { %v1544_v22 = vmul.f32 %v2330_v5, %v3122_v62  ;;  %v1646_v35 = vadd.f32 %v1645_v2, %v1535_v48  ;;  %v1626_v28 = vrot.slane %v1625_v0, 1  ;;  %v1588_v7 = vadd.f32 %v1587_v23, %v1586_v44 }
 0x1a6   : > { %v1672_v21 = vadd.f32 %v1671_v8, %v1537_v16  ;;  %v1696_v43 = vunpack.c.0.s8 %v1695_v42  ;;  %v1613_v14 = vrot.slane %v1612_v56, 1  ;;  %v3394_v16 = vcombine.low %v3392_v6, %v3393_v37 }
 0x1a7   : > { %v2332_v19 = vpop.eup %2331  ;;  %v1634_v11 = vadd.f32 %v1633_v45, %v1544_v22  ;;  %v1627_v13 = vadd.f32 %v1626_v28, %v1625_v0 }
 0x1a8   : > { %v2334_v55 = vpop.eup %2333  ;;  %v1546_v26 = vmul.f32 %v2332_v19, %v3133_v49  ;;  %v1699_v58 = vsub.s32 %v1696_v43, %v3391_v57  ;;  %v1614_v47 = vadd.f32 %v1613_v14, %v1612_v56 }
 0x1a9   : > { %v2336_v62 = vpop.eup %2335  ;;  %v1635_v27 = vrot.slane %v1634_v11, 4  ;;  %v1545_v60 = vmul.f32 %v2334_v55, %v3139_v34  ;;  %v1601_v34 = vadd.f32 %v1600_v39, %v1599_v15 }
 0x1aa   : > { %v1660_v46 = vadd.f32 %v1659_v33, %v1546_v26  ;;  %v1547_v24 = vmul.f32 %v2336_v62, %v3146_v61  ;;  %v1692_v45 = vcombine.low %v1614_v47, %v1627_v13  ;;  %v1700_v19 = vrot.slane %v3394_v16, %v1699_v58  ;;  %v1549_v33 = vld [vmem:[#allocation2 + $0x8] sm:$0x3] }
 0x1ab   : > { %v1636_v59 = vadd.f32 %v1635_v27, %v1634_v11  ;;  %v1647_v52 = vadd.f32 %v1646_v35, %v1545_v60  ;;  %v1691_v38 = vcombine.low %v1588_v7, %v1601_v34  ;;  %v3395_v35 = vlaneseq  ;;  %v1548_v27 = vld [vmem:[#allocation2] sm:$0xff] }
 0x1ac   : > { %v1661_v49 = vrot.slane %v1660_v46, 4  ;;  %v1673_v63 = vadd.f32 %v1672_v21, %v1547_v24  ;;  %v1714_v11 = vrot.slane %v1692_v45, %v1699_v58 }
 0x1ad   : > { %v1637_v20 = vrot.slane %v1636_v59, 2  ;;  %v1648_v50 = vrot.slane %v1647_v52, 4  ;;  %v1707_v51 = vrot.slane %v1691_v38, %v1699_v58  ;;  %vm1761_vm3 = vcmp.lt.s32.totalorder %v3395_v35, 256 }
 0x1ae   : > { %v1662_v17 = vadd.f32 %v1661_v49, %v1660_v46  ;;  %v1674_v40 = vrot.slane %v1673_v63, 4 }
 0x1af   : > { %v1638_v29 = vadd.f32 %v1637_v20, %v1636_v59  ;;  %v1649_v25 = vadd.f32 %v1648_v50, %v1647_v52  ;;  %v1722_v2 = vcombine.low %v1700_v19, %v1707_v51 }
 0x1b0   : > { %v1663_v61 = vrot.slane %v1662_v17, 2  ;;  %v1675_v1 = vadd.f32 %v1674_v40, %v1673_v63 }
 0x1b1   : > { %v1650_v18 = vrot.slane %v1649_v25, 2  ;;  %v1639_v36 = vrot.slane %v1638_v29, 1  ;;  %v1730_v62 = vrot.slane %v1722_v2, %v1699_v58 }
 0x1b2   : > { %v1664_v4 = vadd.f32 %v1663_v61, %v1662_v17  ;;  %v1676_v10 = vrot.slane %v1675_v1, 2 }
 0x1b3   : > { %v1651_v32 = vadd.f32 %v1650_v18, %v1649_v25  ;;  %v1640_v12 = vadd.f32 %v1639_v36, %v1638_v29 }
 0x1b4   : > { %v1665_v54 = vrot.slane %v1664_v4, 1  ;;  %v1677_v5 = vadd.f32 %v1676_v10, %v1675_v1 }
 0x1b5   : > { %v1652_v41 = vrot.slane %v1651_v32, 1 }
 0x1b6   : > { %v1678_v31 = vrot.slane %v1677_v5, 1  ;;  %v1666_v22 = vadd.f32 %v1665_v54, %v1664_v4 }
 0x1b7   : > { %v1653_v48 = vadd.f32 %v1652_v41, %v1651_v32 }
 0x1b8   : > { %v1679_v53 = vadd.f32 %v1678_v31, %v1677_v5 }
 0x1b9   : > { %v1693_v15 = vcombine.low %v1640_v12, %v1653_v48 }
 0x1ba   : > { %v1739_v30 = vcombine.low %v1666_v22, %v1679_v53 }
 0x1bb   : > { %v1721_v55 = vrot.slane %v1693_v15, %v1699_v58 }
 0x1bc   : > { %v1746_v3 = vrot.slane %v1739_v30, %v1699_v58 }
 0x1bd   : > { %v1723_v8 = vcombine.low %v1714_v11, %v1721_v55 }
 0x1be   : > { %v1753_v26 = vrot.slane %v1746_v3, %v1699_v58 }
 0x1bf   : > { %v1737_v44 = vrot.slane %v1723_v8, %v1699_v58 }
 0x1c0   : > { %v1757_v60 = vadd.f32 %v1753_v26, %v1549_v33 }
 0x1c1   : > { %v1738_v21 = vcombine.low %v1730_v62, %v1737_v44  ;;  %1767 = sbr.rel (%p1961_p8) target bundleno = 462 (0x1ce), region = 44 }
 0x1c2   : > { %1763 = vst.msk [vmem:[#allocation2 + $0x8] sm:$0x3] %vm1761_vm3, %v1757_v60 }
 0x1c3   : > { %v1756_v46 = vadd.f32 %v1738_v21, %v1548_v27 }
 0x1c5   : > { %1758 = vst [vmem:[#allocation2] sm:$0xff] %v1756_v46 }
 0x1c9   : > { %v1769_v39 = vld [vmem:[#allocation2 + $0x8] sm:$0x3] }
 0x1ca   : > { %1771 = vst.msk [vmem:[%s2442_s29 + $0x8] sm:$0x3] %vm1761_vm3, %v1769_v39 }
 0x1cc   : > { %v1768_v24 = vld [vmem:[#allocation2] sm:$0xff] }
 0x1cd   : > { %1770 = vst [vmem:[%s2442_s29] sm:$0xff] %v1768_v24 }
 0x1ce PF: > { %s14_s19 = sadd.s32 1, %s2375_s19   ;;  %s3396_s15 = smov %s2367_s17 }
 0x1cf   : > { %p11_p9 = scmp.ge.s32.totalorder %s14_s19, 10   ;;  %s3397_s16 = smov %s2371_s18 }
 0x1d0   : > { %s3398_s17 = smov %s3401_s20  ;;  %s3399_s18 = smov %s3405_s21 }
 0x1d1   :  { %13 = sbr.rel (!%p11_p9) target bundleno = 3 (0x3), region = 74 }

</bundles_post_ra>
